<compile_context>
chip_gen: v5e
topology: v5e:2x2
jax: 0.10.0
libtpu: 0.0.40
codegen_flags: <defaults>
</compile_context>

<pallas_src>
import math
import functools

import jax
import jax.numpy as jnp
from jax import lax
from jax.experimental import pallas as pl
from jax.experimental.pallas import tpu as pltpu


def _cross_attention_kernel(
    x_ref,      # (Bt, S,  H)   input_tensor block
    ctx_ref,    # (Bt, Sc, Cd)  ctx_tensor block
    mask_ref,   # (Bt, 1,  Sc)  ctx attention mask (>0 = keep)
    wq_ref, bq_ref,   # (H, H),  (1, H)
    wk_ref, bk_ref,   # (Cd, H), (1, H)
    wv_ref, bv_ref,   # (Cd, H), (1, H)
    wo_ref, bo_ref,   # (H, H),  (1, H)
    g_ref, beta_ref,  # (1, H),  (1, H)   LayerNorm gamma / beta
    out_ref,          # (Bt, S, H)
    *,
    num_heads: int,
    head_dim: int,
    bt: int,
    s_len: int,
    sc_len: int,
    compute_dtype,
):
    f32 = jnp.float32
    cdt = compute_dtype
    hidden = wq_ref.shape[1]

    # Flatten the batch tile so the projection / output matmuls have Bt*S rows.
    x = x_ref[...].reshape(bt * s_len, x_ref.shape[-1])          # (Bt*S,  H)
    ctx = ctx_ref[...].reshape(bt * sc_len, ctx_ref.shape[-1])   # (Bt*Sc, Cd)

    xc = x.astype(cdt)
    cc = ctx.astype(cdt)

    # --- Q/K/V projections (MXU, f32 accumulation) ---
    q = jnp.dot(xc, wq_ref[...].astype(cdt), preferred_element_type=f32) + bq_ref[...]
    k = jnp.dot(cc, wk_ref[...].astype(cdt), preferred_element_type=f32) + bk_ref[...]
    v = jnp.dot(cc, wv_ref[...].astype(cdt), preferred_element_type=f32) + bv_ref[...]

    scale = 1.0 / math.sqrt(head_dim)
    neg_min = jnp.finfo(f32).min

    # Additive mask bias, computed once (hoisted out of the per-head loop).
    # NOTE: a row with EVERY key masked degenerates to a softmax over the raw
    # scores instead of the exactly-uniform distribution of masked_fill; for
    # any row with >=1 unmasked key the masked weights are 0 either way.
    bias = jnp.where(mask_ref[...] > 0, 0.0, neg_min).astype(f32)   # (Bt, 1, Sc)

    # --- per-head attention, accumulated straight into the output dense ---
    dense = jnp.zeros((bt * s_len, hidden), f32)
    for h in range(num_heads):  # static unroll over heads
        sl = slice(h * head_dim, (h + 1) * head_dim)
        q_h = q[:, sl].reshape(bt, s_len, head_dim)       # (Bt, S,  d)
        k_h = k[:, sl].reshape(bt, sc_len, head_dim)      # (Bt, Sc, d)
        v_h = v[:, sl].reshape(bt, sc_len, head_dim)      # (Bt, Sc, d)

        # Batched over the batch tile; contraction on trailing dim (no k.T).
        scores = jnp.einsum(
            "bqd,bkd->bqk", q_h.astype(cdt), k_h.astype(cdt),
            preferred_element_type=f32) * scale           # (Bt, S, Sc)
        scores = scores + bias

        m = jnp.max(scores, axis=-1, keepdims=True)
        e = jnp.exp(scores - m)
        denom = jnp.sum(e, axis=-1, keepdims=True)
        probs = e * pl.reciprocal(denom, approx=True)
        # TODO(synk): attention-probs dropout omitted (deterministic / eval mode)

        ctx_h = jnp.einsum(
            "bqk,bkd->bqd", probs.astype(cdt), v_h.astype(cdt),
            preferred_element_type=f32)                   # (Bt, S, d)

        # Fold this head's contribution through its Wo row block (sublane slice)
        # instead of concatenating heads along the lane axis.
        dense = dense + jnp.dot(
            ctx_h.reshape(bt * s_len, head_dim).astype(cdt),
            wo_ref[sl, :].astype(cdt),
            preferred_element_type=f32)

    # --- output dense bias + residual + LayerNorm (eps = 1e-12) ---
    dense = dense + bo_ref[...]
    resid = dense + x.astype(f32)
    mean = jnp.mean(resid, axis=-1, keepdims=True)
    var = jnp.mean((resid - mean) ** 2, axis=-1, keepdims=True)
    normed = (resid - mean) * lax.rsqrt(var + 1e-12)
    y = normed * g_ref[...] + beta_ref[...]

    out_ref[...] = y.reshape(bt, s_len, hidden).astype(out_ref.dtype)


def lxmert_cross_attention(
    input_tensor,   # (B, S, H)
    ctx_tensor,     # (B, Sc, Cd)
    ctx_att_mask,   # (B, Sc)   >0 = attend
    params,         # dict of (in, out)-layout weights, biases, LN params
    *,
    num_heads: int,
    batch_tile: int = 8,
    compute_dtype=None,   # e.g. jnp.bfloat16 for bf16 matmul operands
):
    B, S, H = input_tensor.shape
    _, Sc, Cd = ctx_tensor.shape
    assert H % num_heads == 0, "hidden size must be a multiple of num_heads"
    head_dim = H // num_heads

    out_dtype = input_tensor.dtype
    cdt = jnp.dtype(compute_dtype) if compute_dtype is not None else jnp.dtype(out_dtype)

    # Batch tiling: Bt elements per grid step, but keep >=2 grid steps when
    # B > 1 so both v7x TensorCores get work on the "parallel" axis.
    bt = max(1, min(batch_tile, B))
    if B > 1 and bt == B:
        bt = (B + 1) // 2
    num_tiles = (B + bt - 1) // bt
    Bp = num_tiles * bt

    if Bp != B:
        pad = Bp - B
        input_tensor = jnp.pad(input_tensor, ((0, pad), (0, 0), (0, 0)))
        ctx_tensor = jnp.pad(ctx_tensor, ((0, pad), (0, 0), (0, 0)))
        ctx_att_mask = jnp.pad(ctx_att_mask, ((0, pad), (0, 0)), constant_values=1)

    mask3 = ctx_att_mask.reshape(Bp, 1, Sc).astype(jnp.float32)

    # Store the big weight matrices in the compute dtype (halves weight DMA in
    # bf16 mode); biases / LayerNorm params stay f32.
    def wcast(w):
        return w.astype(cdt) if cdt == jnp.bfloat16 else w

    wq, wk, wv, wo = (wcast(params[n]) for n in ("wq", "wk", "wv", "wo"))
    bq, bk, bv, bo = (params[n].astype(jnp.float32) for n in ("bq", "bk", "bv", "bo"))
    ln_g = params["ln_g"].astype(jnp.float32)
    ln_b = params["ln_b"].astype(jnp.float32)

    kernel = functools.partial(
        _cross_attention_kernel,
        num_heads=num_heads, head_dim=head_dim,
        bt=bt, s_len=S, sc_len=Sc, compute_dtype=cdt,
    )

    full = lambda arr: pl.BlockSpec(arr.shape, lambda g: (0, 0))

    grid_spec = pltpu.PrefetchScalarGridSpec(
        num_scalar_prefetch=0,
        grid=(num_tiles,),
        in_specs=[
            pl.BlockSpec((bt, S, H), lambda g: (g, 0, 0)),    # input_tensor
            pl.BlockSpec((bt, Sc, Cd), lambda g: (g, 0, 0)),  # ctx_tensor
            pl.BlockSpec((bt, 1, Sc), lambda g: (g, 0, 0)),   # ctx_att_mask bias source
            full(wq), full(bq),
            full(wk), full(bk),
            full(wv), full(bv),
            full(wo), full(bo),
            full(ln_g), full(ln_b),
        ],
        out_specs=pl.BlockSpec((bt, S, H), lambda g: (g, 0, 0)),
    )

    out = pl.pallas_call(
        kernel,
        out_shape=jax.ShapeDtypeStruct((Bp, S, H), out_dtype),
        grid_spec=grid_spec,
        compiler_params=pltpu.CompilerParams(
            dimension_semantics=("parallel",),
            vmem_limit_bytes=64 * 1024 * 1024,
        ),
    )(
        input_tensor, ctx_tensor, mask3,
        wq, bq, wk, bk, wv, bv, wo, bo, ln_g, ln_b,
    )
    return out[:B]


def _reference(input_tensor, ctx_tensor, ctx_att_mask, params, *, num_heads):
    """Pure-JAX reference mirroring the PyTorch forward (dropout = identity)."""
    B, S, H = input_tensor.shape
    _, Sc, _ = ctx_tensor.shape
    d = H // num_heads
    f32 = jnp.float32

    x = input_tensor.astype(f32)
    c = ctx_tensor.astype(f32)

    q = x @ params["wq"] + params["bq"][0]
    k = c @ params["wk"] + params["bk"][0]
    v = c @ params["wv"] + params["bv"][0]

    def split(t, L):
        return t.reshape(B, L, num_heads, d).transpose(0, 2, 1, 3)

    qh, kh, vh = split(q, S), split(k, Sc), split(v, Sc)
    scores = jnp.einsum("bhqd,bhkd->bhqk", qh, kh) / math.sqrt(d)
    keep = (ctx_att_mask > 0)[:, None, None, :]
    scores = jnp.where(keep, scores, jnp.finfo(f32).min)
    probs = jax.nn.softmax(scores, axis=-1)
    ctx_layer = jnp.einsum("bhqk,bhkd->bhqd", probs, vh)
    ctx_layer = ctx_layer.transpose(0, 2, 1, 3).reshape(B, S, H)

    dense = ctx_layer @ params["wo"] + params["bo"][0]
    resid = dense + x
    mean = jnp.mean(resid, axis=-1, keepdims=True)
    var = jnp.mean((resid - mean) ** 2, axis=-1, keepdims=True)
    return (resid - mean) / jnp.sqrt(var + 1e-12) * params["ln_g"][0] + params["ln_b"][0]


if __name__ == "__main__":
    # Small, module-consistent shapes.
    B, S, Sc = 8, 8, 16
    hidden_size = 32
    ctx_dim = 48
    num_heads = 4

    key = jax.random.PRNGKey(0)
    ks = jax.random.split(key, 12)

    def init_w(k, shape, scale=0.05):
        return (scale * jax.random.normal(k, shape)).astype(jnp.float32)

    params = {
        "wq": init_w(ks[0], (hidden_size, hidden_size)),
        "bq": init_w(ks[1], (1, hidden_size)),
        "wk": init_w(ks[2], (ctx_dim, hidden_size)),
        "bk": init_w(ks[3], (1, hidden_size)),
        "wv": init_w(ks[4], (ctx_dim, hidden_size)),
        "bv": init_w(ks[5], (1, hidden_size)),
        "wo": init_w(ks[6], (hidden_size, hidden_size)),
        "bo": init_w(ks[7], (1, hidden_size)),
        "ln_g": jnp.ones((1, hidden_size), jnp.float32),
        "ln_b": jnp.zeros((1, hidden_size), jnp.float32),
    }

    input_tensor = jax.random.normal(ks[8], (B, S, hidden_size), jnp.float32)
    ctx_tensor = jax.random.normal(ks[9], (B, Sc, ctx_dim), jnp.float32)
    # Mask out some context positions (no fully-masked rows).
    ctx_att_mask = jnp.ones((B, Sc), jnp.float32)
    ctx_att_mask = ctx_att_mask.at[1, -3:].set(0.0).at[5, :5].set(0.0)

    ref = _reference(input_tensor, ctx_tensor, ctx_att_mask, params, num_heads=num_heads)

    # --- f32 path: output dtype matches input dtype, tight correctness check ---
    out = lxmert_cross_attention(
        input_tensor, ctx_tensor, ctx_att_mask, params, num_heads=num_heads)
    out = jax.block_until_ready(out)
    assert out.shape == (B, S, hidden_size)
    assert out.dtype == input_tensor.dtype
    # Tolerance covers the EUP approximate-reciprocal softmax denominator.
    assert jnp.allclose(out, ref, atol=5e-3, rtol=5e-3), (
        "f32 kernel mismatch vs reference: max abs diff = "
        f"{jnp.max(jnp.abs(out - ref))}")

    # --- bf16 mixed-precision path (bf16 operands, f32 accumulation, bf16 out) ---
    out_bf16 = lxmert_cross_attention(
        input_tensor.astype(jnp.bfloat16), ctx_tensor.astype(jnp.bfloat16),
        ctx_att_mask, params, num_heads=num_heads, compute_dtype=jnp.bfloat16)
    out_bf16 = jax.block_until_ready(out_bf16)
    assert out_bf16.shape == (B, S, hidden_size)
    assert out_bf16.dtype == jnp.bfloat16
    assert jnp.allclose(out_bf16.astype(jnp.float32), ref, atol=1e-1, rtol=1e-1), (
        "bf16 kernel mismatch vs reference: max abs diff = "
        f"{jnp.max(jnp.abs(out_bf16.astype(jnp.float32) - ref))}")

    print("KERNEL_OK")
</pallas_src>

<mosaic_0001>
module attributes {stable_mosaic.version = 11 : i64} {
  func.func @_cross_attention_kernel(%arg0: i32, %arg1: memref<4x8x32xf32, #tpu.memory_space<vmem>>, %arg2: memref<4x16x48xf32, #tpu.memory_space<vmem>>, %arg3: memref<4x1x16xf32, #tpu.memory_space<vmem>>, %arg4: memref<32x32xf32, #tpu.memory_space<vmem>>, %arg5: memref<1x32xf32, #tpu.memory_space<vmem>>, %arg6: memref<48x32xf32, #tpu.memory_space<vmem>>, %arg7: memref<1x32xf32, #tpu.memory_space<vmem>>, %arg8: memref<48x32xf32, #tpu.memory_space<vmem>>, %arg9: memref<1x32xf32, #tpu.memory_space<vmem>>, %arg10: memref<32x32xf32, #tpu.memory_space<vmem>>, %arg11: memref<1x32xf32, #tpu.memory_space<vmem>>, %arg12: memref<1x32xf32, #tpu.memory_space<vmem>>, %arg13: memref<1x32xf32, #tpu.memory_space<vmem>>, %arg14: memref<4x8x32xf32, #tpu.memory_space<vmem>>) attributes {dimension_semantics = [#tpu.dimension_semantics<parallel>], iteration_bounds = array<i64: 2>, scalar_prefetch = 0 : i64, scratch_operands = 0 : i64, tpu.core_type = #tpu.core_type<tc>, window_params = [{transform_indices = @transform_0, window_bounds = array<i64: 4, 8, 32>}, {transform_indices = @transform_1, window_bounds = array<i64: 4, 16, 48>}, {transform_indices = @transform_2, window_bounds = array<i64: 4, 1, 16>}, {pipeline_mode = #tpu.pipeline_mode<synchronous>, transform_indices = @transform_3, window_bounds = array<i64: 32, 32>}, {pipeline_mode = #tpu.pipeline_mode<synchronous>, transform_indices = @transform_4, window_bounds = array<i64: 1, 32>}, {pipeline_mode = #tpu.pipeline_mode<synchronous>, transform_indices = @transform_5, window_bounds = array<i64: 48, 32>}, {pipeline_mode = #tpu.pipeline_mode<synchronous>, transform_indices = @transform_6, window_bounds = array<i64: 1, 32>}, {pipeline_mode = #tpu.pipeline_mode<synchronous>, transform_indices = @transform_7, window_bounds = array<i64: 48, 32>}, {pipeline_mode = #tpu.pipeline_mode<synchronous>, transform_indices = @transform_8, window_bounds = array<i64: 1, 32>}, {pipeline_mode = #tpu.pipeline_mode<synchronous>, transform_indices = @transform_9, window_bounds = array<i64: 32, 32>}, {pipeline_mode = #tpu.pipeline_mode<synchronous>, transform_indices = @transform_10, window_bounds = array<i64: 1, 32>}, {pipeline_mode = #tpu.pipeline_mode<synchronous>, transform_indices = @transform_11, window_bounds = array<i64: 1, 32>}, {pipeline_mode = #tpu.pipeline_mode<synchronous>, transform_indices = @transform_12, window_bounds = array<i64: 1, 32>}, {transform_indices = @transform_13, window_bounds = array<i64: 4, 8, 32>}]} {
    %c0 = arith.constant 0 : index
    %c0_0 = arith.constant 0 : index
    %c0_1 = arith.constant 0 : index
    %0 = vector.load %arg1[%c0, %c0_0, %c0_1] : memref<4x8x32xf32, #tpu.memory_space<vmem>>, vector<4x8x32xf32>
    %1 = vector.shape_cast %0 : vector<4x8x32xf32> to vector<32x32xf32>
    %c0_2 = arith.constant 0 : index
    %c0_3 = arith.constant 0 : index
    %c0_4 = arith.constant 0 : index
    %2 = vector.load %arg2[%c0_2, %c0_3, %c0_4] : memref<4x16x48xf32, #tpu.memory_space<vmem>>, vector<4x16x48xf32>
    %3 = vector.shape_cast %2 : vector<4x16x48xf32> to vector<64x48xf32>
    %c0_5 = arith.constant 0 : index
    %c0_6 = arith.constant 0 : index
    %4 = vector.load %arg4[%c0_5, %c0_6] : memref<32x32xf32, #tpu.memory_space<vmem>>, vector<32x32xf32>
    %cst = arith.constant dense<0.000000e+00> : vector<32x32xf32>
    %5 = tpu.matmul %1, %4, %cst {dimension_numbers = #tpu.dot_dimension_numbers<[1], [0], [0], [1], [0, 0, 1, 1], [], []>} : vector<32x32xf32>, vector<32x32xf32>, vector<32x32xf32> -> vector<32x32xf32>
    %c0_7 = arith.constant 0 : index
    %c0_8 = arith.constant 0 : index
    %6 = vector.load %arg5[%c0_7, %c0_8] : memref<1x32xf32, #tpu.memory_space<vmem>>, vector<1x32xf32>
    %7 = vector.broadcast %6 : vector<1x32xf32> to vector<32x32xf32>
    %8 = arith.addf %5, %7 : vector<32x32xf32>
    %c0_9 = arith.constant 0 : index
    %c0_10 = arith.constant 0 : index
    %9 = vector.load %arg6[%c0_9, %c0_10] : memref<48x32xf32, #tpu.memory_space<vmem>>, vector<48x32xf32>
    %cst_11 = arith.constant dense<0.000000e+00> : vector<64x32xf32>
    %10 = tpu.matmul %3, %9, %cst_11 {dimension_numbers = #tpu.dot_dimension_numbers<[1], [0], [0], [1], [0, 0, 1, 1], [], []>} : vector<64x48xf32>, vector<48x32xf32>, vector<64x32xf32> -> vector<64x32xf32>
    %c0_12 = arith.constant 0 : index
    %c0_13 = arith.constant 0 : index
    %11 = vector.load %arg7[%c0_12, %c0_13] : memref<1x32xf32, #tpu.memory_space<vmem>>, vector<1x32xf32>
    %12 = vector.broadcast %11 : vector<1x32xf32> to vector<64x32xf32>
    %13 = arith.addf %10, %12 : vector<64x32xf32>
    %c0_14 = arith.constant 0 : index
    %c0_15 = arith.constant 0 : index
    %14 = vector.load %arg8[%c0_14, %c0_15] : memref<48x32xf32, #tpu.memory_space<vmem>>, vector<48x32xf32>
    %cst_16 = arith.constant dense<0.000000e+00> : vector<64x32xf32>
    %15 = tpu.matmul %3, %14, %cst_16 {dimension_numbers = #tpu.dot_dimension_numbers<[1], [0], [0], [1], [0, 0, 1, 1], [], []>} : vector<64x48xf32>, vector<48x32xf32>, vector<64x32xf32> -> vector<64x32xf32>
    %c0_17 = arith.constant 0 : index
    %c0_18 = arith.constant 0 : index
    %16 = vector.load %arg9[%c0_17, %c0_18] : memref<1x32xf32, #tpu.memory_space<vmem>>, vector<1x32xf32>
    %17 = vector.broadcast %16 : vector<1x32xf32> to vector<64x32xf32>
    %18 = arith.addf %15, %17 : vector<64x32xf32>
    %c0_19 = arith.constant 0 : index
    %c0_20 = arith.constant 0 : index
    %c0_21 = arith.constant 0 : index
    %19 = vector.load %arg3[%c0_19, %c0_20, %c0_21] : memref<4x1x16xf32, #tpu.memory_space<vmem>>, vector<4x1x16xf32>
    %cst_22 = arith.constant 0.000000e+00 : f32
    %20 = vector.broadcast %cst_22 : f32 to vector<4x1x16xf32>
    %21 = arith.cmpf ogt, %19, %20 : vector<4x1x16xf32>
    %cst_23 = arith.constant 0.000000e+00 : f32
    %cst_24 = arith.constant -3.40282347E+38 : f32
    %22 = vector.broadcast %cst_23 : f32 to vector<4x1x16xf32>
    %23 = vector.broadcast %cst_24 : f32 to vector<4x1x16xf32>
    %24 = arith.select %21, %22, %23 : vector<4x1x16xi1>, vector<4x1x16xf32>
    %cst_25 = arith.constant 0.000000e+00 : f32
    %25 = vector.broadcast %cst_25 : f32 to vector<32x32xf32>
    %26 = vector.extract_strided_slice %8 {offsets = [0, 0], sizes = [32, 8], strides = [1, 1]} : vector<32x32xf32> to vector<32x8xf32>
    %27 = vector.shape_cast %26 : vector<32x8xf32> to vector<4x8x8xf32>
    %28 = vector.extract_strided_slice %13 {offsets = [0, 0], sizes = [64, 8], strides = [1, 1]} : vector<64x32xf32> to vector<64x8xf32>
    %29 = vector.shape_cast %28 : vector<64x8xf32> to vector<4x16x8xf32>
    %30 = vector.extract_strided_slice %18 {offsets = [0, 0], sizes = [64, 8], strides = [1, 1]} : vector<64x32xf32> to vector<64x8xf32>
    %31 = vector.shape_cast %30 : vector<64x8xf32> to vector<4x16x8xf32>
    "tpu.trace_start"() <{level = 10 : i32, message = "bqd,bkd->bqk"}> : () -> ()
    %cst_26 = arith.constant dense<0.000000e+00> : vector<4x8x16xf32>
    %32 = tpu.matmul %27, %29, %cst_26 {dimension_numbers = #tpu.dot_dimension_numbers<[2], [2], [1], [1], [0, 0, 0, 1, 1, 1], [0], [0]>} : vector<4x8x8xf32>, vector<4x16x8xf32>, vector<4x8x16xf32> -> vector<4x8x16xf32>
    "tpu.trace_stop"() : () -> ()
    %cst_27 = arith.constant 0.353553385 : f32
    %33 = vector.broadcast %cst_27 : f32 to vector<4x8x16xf32>
    %34 = arith.mulf %32, %33 : vector<4x8x16xf32>
    %35 = vector.broadcast %24 : vector<4x1x16xf32> to vector<4x8x16xf32>
    %36 = arith.addf %34, %35 : vector<4x8x16xf32>
    %cst_28 = arith.constant dense<0xFF800000> : vector<4x8xf32>
    %37 = vector.multi_reduction <maximumf>, %36, %cst_28 [2] : vector<4x8x16xf32> to vector<4x8xf32>
    %38 = vector.shape_cast %37 : vector<4x8xf32> to vector<4x8x1xf32>
    %39 = vector.broadcast %38 : vector<4x8x1xf32> to vector<4x8x16xf32>
    %40 = arith.subf %36, %39 : vector<4x8x16xf32>
    %41 = math.exp %40 : vector<4x8x16xf32>
    %cst_29 = arith.constant dense<0.000000e+00> : vector<4x8xf32>
    %42 = vector.multi_reduction <add>, %41, %cst_29 [2] : vector<4x8x16xf32> to vector<4x8xf32>
    %43 = vector.shape_cast %42 : vector<4x8xf32> to vector<4x8x1xf32>
    %44 = tpu.reciprocal %43 {approx = true} : vector<4x8x1xf32> -> vector<4x8x1xf32>
    %45 = vector.broadcast %44 : vector<4x8x1xf32> to vector<4x8x16xf32>
    %46 = arith.mulf %41, %45 : vector<4x8x16xf32>
    "tpu.trace_start"() <{level = 10 : i32, message = "bqk,bkd->bqd"}> : () -> ()
    %cst_30 = arith.constant dense<0.000000e+00> : vector<4x8x8xf32>
    %47 = tpu.matmul %46, %31, %cst_30 {dimension_numbers = #tpu.dot_dimension_numbers<[2], [1], [1], [2], [0, 0, 0, 1, 1, 2], [0], [0]>} : vector<4x8x16xf32>, vector<4x16x8xf32>, vector<4x8x8xf32> -> vector<4x8x8xf32>
    "tpu.trace_stop"() : () -> ()
    %48 = vector.shape_cast %47 : vector<4x8x8xf32> to vector<32x8xf32>
    %c0_31 = arith.constant 0 : index
    %c0_32 = arith.constant 0 : index
    %49 = vector.load %arg10[%c0_31, %c0_32] : memref<32x32xf32, #tpu.memory_space<vmem>>, vector<8x32xf32>
    %cst_33 = arith.constant dense<0.000000e+00> : vector<32x32xf32>
    %50 = tpu.matmul %48, %49, %cst_33 {dimension_numbers = #tpu.dot_dimension_numbers<[1], [0], [0], [1], [0, 0, 1, 1], [], []>} : vector<32x8xf32>, vector<8x32xf32>, vector<32x32xf32> -> vector<32x32xf32>
    %51 = arith.addf %25, %50 : vector<32x32xf32>
    %52 = vector.extract_strided_slice %8 {offsets = [0, 8], sizes = [32, 8], strides = [1, 1]} : vector<32x32xf32> to vector<32x8xf32>
    %53 = vector.shape_cast %52 : vector<32x8xf32> to vector<4x8x8xf32>
    %54 = vector.extract_strided_slice %13 {offsets = [0, 8], sizes = [64, 8], strides = [1, 1]} : vector<64x32xf32> to vector<64x8xf32>
    %55 = vector.shape_cast %54 : vector<64x8xf32> to vector<4x16x8xf32>
    %56 = vector.extract_strided_slice %18 {offsets = [0, 8], sizes = [64, 8], strides = [1, 1]} : vector<64x32xf32> to vector<64x8xf32>
    %57 = vector.shape_cast %56 : vector<64x8xf32> to vector<4x16x8xf32>
    "tpu.trace_start"() <{level = 10 : i32, message = "bqd,bkd->bqk"}> : () -> ()
    %cst_34 = arith.constant dense<0.000000e+00> : vector<4x8x16xf32>
    %58 = tpu.matmul %53, %55, %cst_34 {dimension_numbers = #tpu.dot_dimension_numbers<[2], [2], [1], [1], [0, 0, 0, 1, 1, 1], [0], [0]>} : vector<4x8x8xf32>, vector<4x16x8xf32>, vector<4x8x16xf32> -> vector<4x8x16xf32>
    "tpu.trace_stop"() : () -> ()
    %cst_35 = arith.constant 0.353553385 : f32
    %59 = vector.broadcast %cst_35 : f32 to vector<4x8x16xf32>
    %60 = arith.mulf %58, %59 : vector<4x8x16xf32>
    %61 = vector.broadcast %24 : vector<4x1x16xf32> to vector<4x8x16xf32>
    %62 = arith.addf %60, %61 : vector<4x8x16xf32>
    %cst_36 = arith.constant dense<0xFF800000> : vector<4x8xf32>
    %63 = vector.multi_reduction <maximumf>, %62, %cst_36 [2] : vector<4x8x16xf32> to vector<4x8xf32>
    %64 = vector.shape_cast %63 : vector<4x8xf32> to vector<4x8x1xf32>
    %65 = vector.broadcast %64 : vector<4x8x1xf32> to vector<4x8x16xf32>
    %66 = arith.subf %62, %65 : vector<4x8x16xf32>
    %67 = math.exp %66 : vector<4x8x16xf32>
    %cst_37 = arith.constant dense<0.000000e+00> : vector<4x8xf32>
    %68 = vector.multi_reduction <add>, %67, %cst_37 [2] : vector<4x8x16xf32> to vector<4x8xf32>
    %69 = vector.shape_cast %68 : vector<4x8xf32> to vector<4x8x1xf32>
    %70 = tpu.reciprocal %69 {approx = true} : vector<4x8x1xf32> -> vector<4x8x1xf32>
    %71 = vector.broadcast %70 : vector<4x8x1xf32> to vector<4x8x16xf32>
    %72 = arith.mulf %67, %71 : vector<4x8x16xf32>
    "tpu.trace_start"() <{level = 10 : i32, message = "bqk,bkd->bqd"}> : () -> ()
    %cst_38 = arith.constant dense<0.000000e+00> : vector<4x8x8xf32>
    %73 = tpu.matmul %72, %57, %cst_38 {dimension_numbers = #tpu.dot_dimension_numbers<[2], [1], [1], [2], [0, 0, 0, 1, 1, 2], [0], [0]>} : vector<4x8x16xf32>, vector<4x16x8xf32>, vector<4x8x8xf32> -> vector<4x8x8xf32>
    "tpu.trace_stop"() : () -> ()
    %74 = vector.shape_cast %73 : vector<4x8x8xf32> to vector<32x8xf32>
    %c8 = arith.constant 8 : index
    %c0_39 = arith.constant 0 : index
    %75 = vector.load %arg10[%c8, %c0_39] : memref<32x32xf32, #tpu.memory_space<vmem>>, vector<8x32xf32>
    %cst_40 = arith.constant dense<0.000000e+00> : vector<32x32xf32>
    %76 = tpu.matmul %74, %75, %cst_40 {dimension_numbers = #tpu.dot_dimension_numbers<[1], [0], [0], [1], [0, 0, 1, 1], [], []>} : vector<32x8xf32>, vector<8x32xf32>, vector<32x32xf32> -> vector<32x32xf32>
    %77 = arith.addf %51, %76 : vector<32x32xf32>
    %78 = vector.extract_strided_slice %8 {offsets = [0, 16], sizes = [32, 8], strides = [1, 1]} : vector<32x32xf32> to vector<32x8xf32>
    %79 = vector.shape_cast %78 : vector<32x8xf32> to vector<4x8x8xf32>
    %80 = vector.extract_strided_slice %13 {offsets = [0, 16], sizes = [64, 8], strides = [1, 1]} : vector<64x32xf32> to vector<64x8xf32>
    %81 = vector.shape_cast %80 : vector<64x8xf32> to vector<4x16x8xf32>
    %82 = vector.extract_strided_slice %18 {offsets = [0, 16], sizes = [64, 8], strides = [1, 1]} : vector<64x32xf32> to vector<64x8xf32>
    %83 = vector.shape_cast %82 : vector<64x8xf32> to vector<4x16x8xf32>
    "tpu.trace_start"() <{level = 10 : i32, message = "bqd,bkd->bqk"}> : () -> ()
    %cst_41 = arith.constant dense<0.000000e+00> : vector<4x8x16xf32>
    %84 = tpu.matmul %79, %81, %cst_41 {dimension_numbers = #tpu.dot_dimension_numbers<[2], [2], [1], [1], [0, 0, 0, 1, 1, 1], [0], [0]>} : vector<4x8x8xf32>, vector<4x16x8xf32>, vector<4x8x16xf32> -> vector<4x8x16xf32>
    "tpu.trace_stop"() : () -> ()
    %cst_42 = arith.constant 0.353553385 : f32
    %85 = vector.broadcast %cst_42 : f32 to vector<4x8x16xf32>
    %86 = arith.mulf %84, %85 : vector<4x8x16xf32>
    %87 = vector.broadcast %24 : vector<4x1x16xf32> to vector<4x8x16xf32>
    %88 = arith.addf %86, %87 : vector<4x8x16xf32>
    %cst_43 = arith.constant dense<0xFF800000> : vector<4x8xf32>
    %89 = vector.multi_reduction <maximumf>, %88, %cst_43 [2] : vector<4x8x16xf32> to vector<4x8xf32>
    %90 = vector.shape_cast %89 : vector<4x8xf32> to vector<4x8x1xf32>
    %91 = vector.broadcast %90 : vector<4x8x1xf32> to vector<4x8x16xf32>
    %92 = arith.subf %88, %91 : vector<4x8x16xf32>
    %93 = math.exp %92 : vector<4x8x16xf32>
    %cst_44 = arith.constant dense<0.000000e+00> : vector<4x8xf32>
    %94 = vector.multi_reduction <add>, %93, %cst_44 [2] : vector<4x8x16xf32> to vector<4x8xf32>
    %95 = vector.shape_cast %94 : vector<4x8xf32> to vector<4x8x1xf32>
    %96 = tpu.reciprocal %95 {approx = true} : vector<4x8x1xf32> -> vector<4x8x1xf32>
    %97 = vector.broadcast %96 : vector<4x8x1xf32> to vector<4x8x16xf32>
    %98 = arith.mulf %93, %97 : vector<4x8x16xf32>
    "tpu.trace_start"() <{level = 10 : i32, message = "bqk,bkd->bqd"}> : () -> ()
    %cst_45 = arith.constant dense<0.000000e+00> : vector<4x8x8xf32>
    %99 = tpu.matmul %98, %83, %cst_45 {dimension_numbers = #tpu.dot_dimension_numbers<[2], [1], [1], [2], [0, 0, 0, 1, 1, 2], [0], [0]>} : vector<4x8x16xf32>, vector<4x16x8xf32>, vector<4x8x8xf32> -> vector<4x8x8xf32>
    "tpu.trace_stop"() : () -> ()
    %100 = vector.shape_cast %99 : vector<4x8x8xf32> to vector<32x8xf32>
    %c16 = arith.constant 16 : index
    %c0_46 = arith.constant 0 : index
    %101 = vector.load %arg10[%c16, %c0_46] : memref<32x32xf32, #tpu.memory_space<vmem>>, vector<8x32xf32>
    %cst_47 = arith.constant dense<0.000000e+00> : vector<32x32xf32>
    %102 = tpu.matmul %100, %101, %cst_47 {dimension_numbers = #tpu.dot_dimension_numbers<[1], [0], [0], [1], [0, 0, 1, 1], [], []>} : vector<32x8xf32>, vector<8x32xf32>, vector<32x32xf32> -> vector<32x32xf32>
    %103 = arith.addf %77, %102 : vector<32x32xf32>
    %104 = vector.extract_strided_slice %8 {offsets = [0, 24], sizes = [32, 8], strides = [1, 1]} : vector<32x32xf32> to vector<32x8xf32>
    %105 = vector.shape_cast %104 : vector<32x8xf32> to vector<4x8x8xf32>
    %106 = vector.extract_strided_slice %13 {offsets = [0, 24], sizes = [64, 8], strides = [1, 1]} : vector<64x32xf32> to vector<64x8xf32>
    %107 = vector.shape_cast %106 : vector<64x8xf32> to vector<4x16x8xf32>
    %108 = vector.extract_strided_slice %18 {offsets = [0, 24], sizes = [64, 8], strides = [1, 1]} : vector<64x32xf32> to vector<64x8xf32>
    %109 = vector.shape_cast %108 : vector<64x8xf32> to vector<4x16x8xf32>
    "tpu.trace_start"() <{level = 10 : i32, message = "bqd,bkd->bqk"}> : () -> ()
    %cst_48 = arith.constant dense<0.000000e+00> : vector<4x8x16xf32>
    %110 = tpu.matmul %105, %107, %cst_48 {dimension_numbers = #tpu.dot_dimension_numbers<[2], [2], [1], [1], [0, 0, 0, 1, 1, 1], [0], [0]>} : vector<4x8x8xf32>, vector<4x16x8xf32>, vector<4x8x16xf32> -> vector<4x8x16xf32>
    "tpu.trace_stop"() : () -> ()
    %cst_49 = arith.constant 0.353553385 : f32
    %111 = vector.broadcast %cst_49 : f32 to vector<4x8x16xf32>
    %112 = arith.mulf %110, %111 : vector<4x8x16xf32>
    %113 = vector.broadcast %24 : vector<4x1x16xf32> to vector<4x8x16xf32>
    %114 = arith.addf %112, %113 : vector<4x8x16xf32>
    %cst_50 = arith.constant dense<0xFF800000> : vector<4x8xf32>
    %115 = vector.multi_reduction <maximumf>, %114, %cst_50 [2] : vector<4x8x16xf32> to vector<4x8xf32>
    %116 = vector.shape_cast %115 : vector<4x8xf32> to vector<4x8x1xf32>
    %117 = vector.broadcast %116 : vector<4x8x1xf32> to vector<4x8x16xf32>
    %118 = arith.subf %114, %117 : vector<4x8x16xf32>
    %119 = math.exp %118 : vector<4x8x16xf32>
    %cst_51 = arith.constant dense<0.000000e+00> : vector<4x8xf32>
    %120 = vector.multi_reduction <add>, %119, %cst_51 [2] : vector<4x8x16xf32> to vector<4x8xf32>
    %121 = vector.shape_cast %120 : vector<4x8xf32> to vector<4x8x1xf32>
    %122 = tpu.reciprocal %121 {approx = true} : vector<4x8x1xf32> -> vector<4x8x1xf32>
    %123 = vector.broadcast %122 : vector<4x8x1xf32> to vector<4x8x16xf32>
    %124 = arith.mulf %119, %123 : vector<4x8x16xf32>
    "tpu.trace_start"() <{level = 10 : i32, message = "bqk,bkd->bqd"}> : () -> ()
    %cst_52 = arith.constant dense<0.000000e+00> : vector<4x8x8xf32>
    %125 = tpu.matmul %124, %109, %cst_52 {dimension_numbers = #tpu.dot_dimension_numbers<[2], [1], [1], [2], [0, 0, 0, 1, 1, 2], [0], [0]>} : vector<4x8x16xf32>, vector<4x16x8xf32>, vector<4x8x8xf32> -> vector<4x8x8xf32>
    "tpu.trace_stop"() : () -> ()
    %126 = vector.shape_cast %125 : vector<4x8x8xf32> to vector<32x8xf32>
    %c24 = arith.constant 24 : index
    %c0_53 = arith.constant 0 : index
    %127 = vector.load %arg10[%c24, %c0_53] : memref<32x32xf32, #tpu.memory_space<vmem>>, vector<8x32xf32>
    %cst_54 = arith.constant dense<0.000000e+00> : vector<32x32xf32>
    %128 = tpu.matmul %126, %127, %cst_54 {dimension_numbers = #tpu.dot_dimension_numbers<[1], [0], [0], [1], [0, 0, 1, 1], [], []>} : vector<32x8xf32>, vector<8x32xf32>, vector<32x32xf32> -> vector<32x32xf32>
    %129 = arith.addf %103, %128 : vector<32x32xf32>
    %c0_55 = arith.constant 0 : index
    %c0_56 = arith.constant 0 : index
    %130 = vector.load %arg11[%c0_55, %c0_56] : memref<1x32xf32, #tpu.memory_space<vmem>>, vector<1x32xf32>
    %131 = vector.broadcast %130 : vector<1x32xf32> to vector<32x32xf32>
    %132 = arith.addf %129, %131 : vector<32x32xf32>
    %133 = arith.addf %132, %1 : vector<32x32xf32>
    %cst_57 = arith.constant dense<0.000000e+00> : vector<32xf32>
    %134 = vector.multi_reduction <add>, %133, %cst_57 [1] : vector<32x32xf32> to vector<32xf32>
    %135 = vector.shape_cast %134 : vector<32xf32> to vector<32x1xf32>
    %cst_58 = arith.constant 3.200000e+01 : f32
    %136 = vector.broadcast %cst_58 : f32 to vector<32x1xf32>
    %137 = arith.divf %135, %136 : vector<32x1xf32>
    %138 = vector.broadcast %137 : vector<32x1xf32> to vector<32x32xf32>
    %139 = arith.subf %133, %138 : vector<32x32xf32>
    %140 = arith.mulf %139, %139 : vector<32x32xf32>
    %cst_59 = arith.constant dense<0.000000e+00> : vector<32xf32>
    %141 = vector.multi_reduction <add>, %140, %cst_59 [1] : vector<32x32xf32> to vector<32xf32>
    %142 = vector.shape_cast %141 : vector<32xf32> to vector<32x1xf32>
    %cst_60 = arith.constant 3.200000e+01 : f32
    %143 = vector.broadcast %cst_60 : f32 to vector<32x1xf32>
    %144 = arith.divf %142, %143 : vector<32x1xf32>
    %145 = vector.broadcast %137 : vector<32x1xf32> to vector<32x32xf32>
    %146 = arith.subf %133, %145 : vector<32x32xf32>
    %cst_61 = arith.constant 9.99999996E-13 : f32
    %147 = vector.broadcast %cst_61 : f32 to vector<32x1xf32>
    %148 = arith.addf %144, %147 : vector<32x1xf32>
    %149 = math.rsqrt %148 : vector<32x1xf32>
    %150 = vector.broadcast %149 : vector<32x1xf32> to vector<32x32xf32>
    %151 = arith.mulf %146, %150 : vector<32x32xf32>
    %c0_62 = arith.constant 0 : index
    %c0_63 = arith.constant 0 : index
    %152 = vector.load %arg12[%c0_62, %c0_63] : memref<1x32xf32, #tpu.memory_space<vmem>>, vector<1x32xf32>
    %153 = vector.broadcast %152 : vector<1x32xf32> to vector<32x32xf32>
    %154 = arith.mulf %151, %153 : vector<32x32xf32>
    %c0_64 = arith.constant 0 : index
    %c0_65 = arith.constant 0 : index
    %155 = vector.load %arg13[%c0_64, %c0_65] : memref<1x32xf32, #tpu.memory_space<vmem>>, vector<1x32xf32>
    %156 = vector.broadcast %155 : vector<1x32xf32> to vector<32x32xf32>
    %157 = arith.addf %154, %156 : vector<32x32xf32>
    %158 = vector.shape_cast %157 : vector<32x32xf32> to vector<4x8x32xf32>
    %c0_66 = arith.constant 0 : index
    %c0_67 = arith.constant 0 : index
    %c0_68 = arith.constant 0 : index
    %159 = vector.load %arg14[%c0_66, %c0_67, %c0_68] : memref<4x8x32xf32, #tpu.memory_space<vmem>>, vector<4x8x32xf32>
    tpu.vector_store %arg14[%c0_66, %c0_67, %c0_68], %158 {strides = array<i32>} : memref<4x8x32xf32, #tpu.memory_space<vmem>>, vector<4x8x32xf32>,
    return
  }
  func.func @transform_0(%arg0: i32) -> (i32, i32, i32) {
    %c0_i32 = arith.constant 0 : i32
    %c0_i32_0 = arith.constant 0 : i32
    %c0_i32_1 = arith.constant 0 : i32
    return %arg0, %c0_i32, %c0_i32_0 : i32, i32, i32
  }
  func.func @transform_1(%arg0: i32) -> (i32, i32, i32) {
    %c0_i32 = arith.constant 0 : i32
    %c0_i32_0 = arith.constant 0 : i32
    %c0_i32_1 = arith.constant 0 : i32
    return %arg0, %c0_i32, %c0_i32_0 : i32, i32, i32
  }
  func.func @transform_2(%arg0: i32) -> (i32, i32, i32) {
    %c0_i32 = arith.constant 0 : i32
    %c0_i32_0 = arith.constant 0 : i32
    %c0_i32_1 = arith.constant 0 : i32
    return %arg0, %c0_i32, %c0_i32_0 : i32, i32, i32
  }
  func.func @transform_3(%arg0: i32) -> (i32, i32) {
    %c0_i32 = arith.constant 0 : i32
    %c0_i32_0 = arith.constant 0 : i32
    %c0_i32_1 = arith.constant 0 : i32
    return %c0_i32, %c0_i32_0 : i32, i32
  }
  func.func @transform_4(%arg0: i32) -> (i32, i32) {
    %c0_i32 = arith.constant 0 : i32
    %c0_i32_0 = arith.constant 0 : i32
    %c0_i32_1 = arith.constant 0 : i32
    return %c0_i32, %c0_i32_0 : i32, i32
  }
  func.func @transform_5(%arg0: i32) -> (i32, i32) {
    %c0_i32 = arith.constant 0 : i32
    %c0_i32_0 = arith.constant 0 : i32
    %c0_i32_1 = arith.constant 0 : i32
    return %c0_i32, %c0_i32_0 : i32, i32
  }
  func.func @transform_6(%arg0: i32) -> (i32, i32) {
    %c0_i32 = arith.constant 0 : i32
    %c0_i32_0 = arith.constant 0 : i32
    %c0_i32_1 = arith.constant 0 : i32
    return %c0_i32, %c0_i32_0 : i32, i32
  }
  func.func @transform_7(%arg0: i32) -> (i32, i32) {
    %c0_i32 = arith.constant 0 : i32
    %c0_i32_0 = arith.constant 0 : i32
    %c0_i32_1 = arith.constant 0 : i32
    return %c0_i32, %c0_i32_0 : i32, i32
  }
  func.func @transform_8(%arg0: i32) -> (i32, i32) {
    %c0_i32 = arith.constant 0 : i32
    %c0_i32_0 = arith.constant 0 : i32
    %c0_i32_1 = arith.constant 0 : i32
    return %c0_i32, %c0_i32_0 : i32, i32
  }
  func.func @transform_9(%arg0: i32) -> (i32, i32) {
    %c0_i32 = arith.constant 0 : i32
    %c0_i32_0 = arith.constant 0 : i32
    %c0_i32_1 = arith.constant 0 : i32
    return %c0_i32, %c0_i32_0 : i32, i32
  }
  func.func @transform_10(%arg0: i32) -> (i32, i32) {
    %c0_i32 = arith.constant 0 : i32
    %c0_i32_0 = arith.constant 0 : i32
    %c0_i32_1 = arith.constant 0 : i32
    return %c0_i32, %c0_i32_0 : i32, i32
  }
  func.func @transform_11(%arg0: i32) -> (i32, i32) {
    %c0_i32 = arith.constant 0 : i32
    %c0_i32_0 = arith.constant 0 : i32
    %c0_i32_1 = arith.constant 0 : i32
    return %c0_i32, %c0_i32_0 : i32, i32
  }
  func.func @transform_12(%arg0: i32) -> (i32, i32) {
    %c0_i32 = arith.constant 0 : i32
    %c0_i32_0 = arith.constant 0 : i32
    %c0_i32_1 = arith.constant 0 : i32
    return %c0_i32, %c0_i32_0 : i32, i32
  }
  func.func @transform_13(%arg0: i32) -> (i32, i32, i32) {
    %c0_i32 = arith.constant 0 : i32
    %c0_i32_0 = arith.constant 0 : i32
    %c0_i32_1 = arith.constant 0 : i32
    return %arg0, %c0_i32, %c0_i32_0 : i32, i32, i32
  }
}

</mosaic_0001>

<bundles_post_ra>
// kernel: tpu_custom_call.1
= control target key start
LH: loop header
LB: loop body
LE: loop exit
PB: predicated region body
PF: predicated region fallthrough
CT: control target
= control target key end

     0   :  { %s3731_s0 = inlined_call_operand.hbm [shape: f32[8,8,32], index: 0, kind: input, shape index: {}]   ;;  %s3732_s1 = inlined_call_operand.vmem [shape: f32[8,16,48], index: 1, kind: input, shape index: {}]   ;;  %s3733_s2 = inlined_call_operand.hbm [shape: f32[8,1,16], index: 2, kind: input, shape index: {}]   ;;  %s3734_s3 = inlined_call_operand.hbm [shape: f32[32,32], index: 3, kind: input, shape index: {}]   ;;  %s3735_s4 = inlined_call_operand.vmem [shape: f32[1,32], index: 4, kind: input, shape index: {}]   ;;  %s3736_s5 = inlined_call_operand.vmem [shape: f32[48,32], index: 5, kind: input, shape index: {}]   ;;  %s3737_s6 = inlined_call_operand.vmem [shape: f32[1,32], index: 6, kind: input, shape index: {}]   ;;  %s3738_s7 = inlined_call_operand.vmem [shape: f32[48,32], index: 7, kind: input, shape index: {}]   ;;  %s3739_s8 = inlined_call_operand.vmem [shape: f32[1,32], index: 8, kind: input, shape index: {}]   ;;  %s3740_s9 = inlined_call_operand.hbm [shape: f32[32,32], index: 9, kind: input, shape index: {}]   ;;  %s3741_s10 = inlined_call_operand.vmem [shape: f32[1,32], index: 10, kind: input, shape index: {}]   ;;  %s3742_s11 = inlined_call_operand.vmem [shape: f32[1,32], index: 11, kind: input, shape index: {}]   ;;  %s3743_s12 = inlined_call_operand.vmem [shape: f32[1,32], index: 12, kind: input, shape index: {}]   ;;  %s3744_s13 = inlined_call_operand.hbm [shape: f32[8,8,32], index: 13, kind: output, shape index: {}]  }
   0x1   :  { %3755 = sst [smem:[#allocation22_spill]] %s3734_s3 }
   0x2   :  { %3756 = sst [smem:[#allocation23_spill]] %s3740_s9 }
   0x3   :  { %3757 = sst [smem:[#allocation24_spill]] %s3741_s10 }
   0x4   :  { %3758 = sst [smem:[#allocation25_spill]] %s3742_s11 }
   0x5   :  { %3759 = sst [smem:[#allocation26_spill]] %s3743_s12 }
   0x6   :  { %3760 = sst [smem:[#allocation27_spill]] %s3744_s13 }
   0x7   :  { %18 = vsyncpa [#allocation3], 0 }
   0x8   :  { %20 = vsyncpa [#allocation3 + $0x1], 0 }
   0x9   :  { %21 = vsyncpa [#allocation6], 0 }
   0xa   :  { %23 = vsyncpa [#allocation6 + $0x1], 0 }
   0xb   :  { %24 = vsyncpa [#allocation9], 0 }
   0xc   :  { %25 = vsyncpa [#allocation4], 0 }
   0xd   :  { %27 = vsyncpa [#allocation4 + $0x1], 0  ;;  %s3018_s25 = smov 0   ;;  %s3020_s26 = smov 0  }
   0xe   :  { %s3022_s27 = smov 0   ;;  %s3024_s28 = smov 0  }
   0xf LB: > { %3761 = sst [smem:[#allocation16_spill]] %s2921_s25  ;;  %s3039_s29 = sadd.s32 4294967295, %s2933_s28   ;;  %s2933_s28 = sphi %s3024_s28, %s3784_s28   ;;  %s2929_s27 = sphi %s3022_s27, %s3786_s27   ;;  %s2925_s26 = sphi %s3020_s26, %s3788_s26   ;;  %s2921_s25 = sphi %s3018_s25, %s3787_s25  }
  0x10   : > { %3762 = sst [smem:[#allocation17_spill]] %s2929_s27  ;;  %s2380_s30 = sadd.s32 4294967294, %s2933_s28  }
  0x11   : > { %p53_p0 = scmp.ne.s32.totalorder %s2925_s26, %s2921_s25  ;;  %p54_p1 = scmp.eq.s32.totalorder %s3039_s29, 0 }
  0x12   : > { %p339_p2 = scmp.eq.s32.totalorder %s3039_s29, 1  ;;  %p345_p3 = scmp.eq.s32.totalorder %s2380_s30, 1 }
  0x13   : > { %p3048_p4 = por %p54_p1, %p53_p0  ;;  %p2381_p5 = scmp.ge.s32.totalorder %s2933_s28, 1 }
  0x14   : > { %p3053_p6 = por %p345_p3, %p53_p0  ;;  %p352_p7 = scmp.lt.s32.totalorder %s2933_s28, 3 }
  0x15   : > { %s3766_s3 = sld [smem:[#allocation22_spill]]  ;;  %s2935_s20 = smov [#allocation7]  }
  0x16   : > { %s3764_s15 = scalar_select %p3053_p6, 1, 0 }
  0x17   : > { %p3061_p8 = pnand %p2381_p5, %p352_p7  ;;  %s365_s21 = sshll.u32 %s2935_s20, 4  ;;  %s366_s21 = int_to_ptr.vmem [resolvable:$true] %s365_s21 }
  0x18   : > { %3765 = sst [smem:[#allocation18_spill]] %s3764_s15  ;;  %s3745_s30 = smov 128  }
  0x19   : > { %p2522_p9 = pneg %p3061_p8  ;;  %s3768_s9 = sld [smem:[#allocation23_spill]] }
  0x1a   : > { %s3746_s16 = smov 8   ;;  %s2938_s17 = smov [#allocation8]  }
  0x1b   : > { %s363_s18 = sshll.u32 %s3766_s3, 4  ;;  %p2523_p10 = pnand %p2522_p9, %p54_p1  ;;  %s364_s18 = int_to_ptr.hbm [resolvable:$true] %s363_s18 }
  0x1c   : > { %s394_s20 = sshll.u32 %s2938_s17, 4  ;;  %s3080_s22 = sadd.s32 1, %s2933_s28   ;;  %s395_s20 = int_to_ptr.vmem [resolvable:$true] %s394_s20 }
  0x1d   : > { %2525 = dma.hbm_to_vmem [thread:$0]  (!%p2523_p10), %s364_s18, 512, %s366_s21, [#allocation6], %s3745_s30, %s3745_s30, %s3746_s16  }
  0x1e   : > { %3769 = sst [smem:[#allocation19_spill]] %s3080_s22  ;;  %s40_s23 = sadd.s32 1, %s2929_s27 }
  0x1f   : > { %s392_s24 = sshll.u32 %s3768_s9, 4  ;;  %s37_s3 = ssub.s32 %s2933_s28, %s3080_s22  ;;  %s393_s24 = int_to_ptr.hbm [resolvable:$true] %s392_s24 }
  0x20   : > { %2528 = dma.hbm_to_vmem [thread:$0]  (!%p2523_p10), %s393_s24, 512, %s395_s20, [#allocation9], %s3745_s30, %s3745_s30, %s3746_s16  }
  0x21   : > { %p47_p12 = scmp.ne.s32.totalorder %s2929_s27, %s2925_s26  ;;  %p38_p13 = scmp.eq.s32.totalorder %s37_s3, 0 }
  0x22   : > { %p48_p0 = scmp.eq.s32.totalorder %s2933_s28, 0  ;;  %p2542_p5 = scmp.lt.s32.totalorder %s2933_s28, 2 }
  0x23   : > { %p3090_p3 = por %p339_p2, %p47_p12  ;;  %s3099_s17 = sand.u32 1, %s2929_s27  }
  0x24   : > { %s3096_s21 = scalar_select %p38_p13, %s2929_s27, %s40_s23  }
  0x25   : > { %s3770_s18 = scalar_select %p3090_p3, 1, 0 }
  0x26   : > { %3772 = sst [smem:[#allocation21_spill]] %s3096_s21  ;;  %p49_p7 = por %p48_p0, %p47_p12 }
  0x27   : > { %3771 = sst [smem:[#allocation20_spill]] %s3770_s18  ;;  %s2385_s24 = sshll.u32 %s3099_s17, 5 }
  0x28   : > { %s2504_s20 = sshll.u32 %s2933_s28, 5  ;;  %s421_s9 = scalar_lea.vmem [#allocation2], %s2385_s24 }
  0x29   : > { %s426_s16 = scalar_lea.hbm %s3731_s0, %s2504_s20  ;;  %s429_s22 = sshll.u32 %s421_s9, 4  ;;  %s430_s22 = int_to_ptr.vmem [resolvable:$true] %s429_s22 }
  0x2a   : > { %s427_s15 = sshll.u32 %s426_s16, 4  ;;  %p3106_p2 = pnand %p2542_p5, %p49_p7  ;;  %s428_s15 = int_to_ptr.hbm [resolvable:$true] %s427_s15 }
  0x2b   : > { %s449_s21 = sand.u32 1, %s2933_s28   ;;  %s2388_s27 = sshll.u32 %s3099_s17, 2 }
  0x2c   : > { %s418_s25 = scalar_lea.sflag [#allocation3], %s3099_s17  ;;  %s2795_s18 = sshra.s32 %s428_s15, 4  ;;  %s2796_s18 = int_to_ptr.hbm [resolvable:$true] %s2795_s18 }
  0x2d   : > { %s2797_s13 = scalar_lea.hbm %s2796_s18, 32  ;;  %p2799_p10 = pneg %p3106_p2 }
  0x2e   : > { %p2798_p9 = scmp.ne.s32.totalorder %s2796_s18, %s2797_s13  ;;  %s2802_s16 = scalar_lea.hbm %s3731_s0, 64 }
  0x2f   : > { %p2803_p0 = scmp.lt.s32.totalorder %s2796_s18, %s3731_s0  ;;  %p2804_p5 = scmp.lt.s32.totalorder %s2802_s16, %s2797_s13 }
  0x30   : > { %p2800_p12 = pnand %p2799_p10, %p2798_p9 }
  0x31   : > { %p2805_p7 = por %p2804_p5, %p2803_p0 }
  0x32   : > { %p2801_p13 = pneg %p2800_p12 }
  0x34   : > { %p2806_p11 = pnand %p2805_p7, %p2801_p13 }
  0x36   : > { %2809 = shalt.err (!%p2806_p11)
}
  0x37   : > { %s3774_s17 = smov 8   ;;  %s3775_s3 = smov 128  }
  0x38   : > { %2532 = dma.hbm_to_vmem [thread:$0]  (!%p3106_p2), %s428_s15, 512, %s430_s22, %s418_s25, %s3775_s3, %s3775_s3, %s3774_s17  }
  0x39   : > { %s2389_s12 = sshll.u32 %s2933_s28, 2  ;;  %s453_s10 = scalar_lea.vmem [#allocation5], %s2388_s27 }
  0x3a   : > { %s457_s30 = scalar_lea.hbm %s3733_s2, %s2389_s12  ;;  %s460_s24 = sshll.u32 %s453_s10, 4  ;;  %s461_s24 = int_to_ptr.vmem [resolvable:$true] %s460_s24 }
  0x3b   : > { %s458_s18 = sshll.u32 %s457_s30, 4  ;;  %s450_s13 = scalar_lea.sflag [#allocation6], %s449_s21  ;;  %s459_s18 = int_to_ptr.hbm [resolvable:$true] %s458_s18 }
  0x3c   : > { %s2825_s16 = sshra.s32 %s459_s18, 4  ;;  %s2832_s22 = scalar_lea.hbm %s3733_s2, 8  ;;  %s2826_s16 = int_to_ptr.hbm [resolvable:$true] %s2825_s16 }
  0x3d   : > { %s2827_s20 = scalar_lea.hbm %s2826_s16, 4  ;;  %p2833_p13 = scmp.lt.s32.totalorder %s2826_s16, %s3733_s2 }
  0x3e   : > { %p2828_p11 = scmp.ne.s32.totalorder %s2826_s16, %s2827_s20  ;;  %p2834_p0 = scmp.lt.s32.totalorder %s2832_s22, %s2827_s20 }
  0x40   : > { %p2830_p9 = pnand %p2828_p11, %p2799_p10  ;;  %p2835_p5 = por %p2834_p0, %p2833_p13 }
  0x42   : > { %p2831_p12 = pneg %p2830_p9 }
  0x44   : > { %p2836_p7 = pnand %p2835_p5, %p2831_p12 }
  0x46   : > { %2839 = shalt.err (!%p2836_p7)
}
  0x47   : > { %s2939_s10 = smov 16   ;;  %s2940_s27 = smov 1  }
  0x48   : > { %2535 = dma.hbm_to_vmem [thread:$0]  (!%p3106_p2), %s459_s18, 64, %s461_s24, %s450_s13, %s2939_s10, %s2939_s10, %s2940_s27  }
  0x49   : > { %472 = sbr.rel (%p3061_p8) target bundleno = 2507 (0x9cb), region = 72  ;;  %s3147_s21 = sand.u32 (!%p3061_p8), 1, %s2925_s26  }
  0x4a   : > { %s2391_s17 = sshll.u32 (!%p3061_p8), %s3147_s21, 5  ;;  %s475_s3 = scalar_lea.sflag (!%p3061_p8), [#allocation3], %s3147_s21 }
  0x4b   : > { %s3153_s9 = scalar_lea.vmem (!%p3061_p8), [#allocation2], %s2391_s17 }
  0x4e   : > { %2900 = dma.done.wait (%p3048_p4), %s475_s3, 512  }
  0x4f   : > { %2902 = vsyncadd (%p3048_p4), %s475_s3, 4294966784  ;;  %s484_s19 = sand.u32 1, %s3039_s29   ;;  %s2392_s23 = sshll.u32 %s3147_s21, 2 }
  0x50   : > { %s485_s30 = scalar_lea.sflag [#allocation6], %s484_s19  ;;  %s3161_s24 = scalar_lea.vmem [#allocation5], %s2392_s23 }
  0x51   : > { %2904 = dma.done.wait (%p3048_p4), %s485_s30, 64  }
  0x52   : > { %2906 = vsyncadd (%p3048_p4), %s485_s30, 4294967232 }
  0x53   : > { %2908 = dma.done.wait (%p54_p1), [#allocation6], 512  }
  0x54   : > { %2910 = vsyncadd (%p54_p1), [#allocation6], 4294966784 }
  0x55   : > { %2912 = dma.done.wait (%p54_p1), [#allocation9], 512  }
  0x56   : > { %2914 = vsyncadd (%p54_p1), [#allocation9], 4294966784  ;;  %s2396_s18 = sshll.u32 %s3039_s29, 2  ;;  %v630_v0 = vld [vmem:[%s3736_s5 + $0x28] sm:$0xff]  ;;  %v629_v1 = vld [vmem:[%s3736_s5 + $0x20] sm:$0xff]  ;;  %vm583_vm0 = vcmask 261120  }
  0x57   : > { %p555_p8 = scmp.lt.s32.totalorder %s2396_s18, 7  ;;  %670 = vmatpush.msra.mxu1 %v630_v0  ;;  %v628_v2 = vld [vmem:[%s3736_s5 + $0x18] sm:$0xff]  ;;  %v578_v3 = vld [vmem:[#allocation7 + $0x18] sm:$0xff]  ;;  %v627_v5 = vld [vmem:[%s3736_s5 + $0x10] sm:$0xff]  ;;  %vm635_vm1 = vcmask 392192   ;;  %vm764_vm2 = vcmask 64512  }
  0x58   : > { %608 = vmatpush.msra.mxu0 %v578_v3  ;;  %v577_v4 = vld [vmem:[#allocation7 + $0x10] sm:$0xff]  ;;  %v576_v6 = vld [vmem:[#allocation7 + $0x8] sm:$0xff]  ;;  %v626_v7 = vld [vmem:[%s3736_s5 + $0x8] sm:$0xff]  ;;  %s2941_s25 = smov 120   ;;  %v2942_v55 = vmov -3.4028235e+38  }
  0x59   : > { %s3790_s18 = smov (!%p555_p8, %s2396_s18), 7  ;;  %671 = vmatpush.msra.mxu1 %v629_v1  ;;  %v575_v8 = vld [vmem:[#allocation7] sm:$0xff]  ;;  %v563_v9 = vld [vmem:[%s3153_s9] sm:$0xff]  ;;  %v565_v14 = vld [vmem:[%s3153_s9 + $0x10] sm:$0xff]  ;;  %vm901_vm4 = vcmask 130048   ;;  %s2943_s14 = smov 112  }
  0x5a   : > { %s2505_s22 = sshll.u32 %s3790_s18, 4  ;;  %609 = vmatpush.msra.mxu0 %v577_v4  ;;  %v625_v10 = vld [vmem:[%s3736_s5] sm:$0xff]  ;;  %v564_v12 = vld [vmem:[%s3153_s9 + $0x8] sm:$0xff]  ;;  %v566_v17 = vld [vmem:[%s3153_s9 + $0x18] sm:$0xff]  ;;  %s2944_s20 = smov 104  }
  0x5b   : > { %672 = vmatpush.msra.mxu1 %v628_v2  ;;  %s3194_s23 = scalar_lea.vmem %s3732_s1, %s2505_s22  ;;  %v2652_v24 = vld [vmem:[%s3735_s4] ss:$0 sm:$0xff]  ;;  %v706_v37 = vld [vmem:[%s3738_s7 + $0x28] sm:$0xff]  ;;  %v704_v39 = vld [vmem:[%s3738_s7 + $0x18] sm:$0xff]  ;;  %s3776_s22 = sld [smem:[#allocation24_spill]] }
  0x5c   : > { %610 = vmatpush.msra.mxu0 %v576_v6  ;;  %v3201_v11 = vld [vmem:[%s3194_s23] sm:$0xff]  ;;  %v3208_v13 = vld [vmem:[%s3194_s23 + $0x8] sm:$0xff]  ;;  %v3215_v15 = vld [vmem:[%s3194_s23 + $0x10] sm:$0xff]  ;;  %721 = vmatpush.msra.mxu2 %v706_v37  ;;  %s3777_s12 = sld [smem:[#allocation25_spill]]  ;;  %s2506_s19 = sshll.u32 %s3039_s29, 5 }
  0x5d   : > { %673 = vmatpush.msra.mxu1 %v627_v5  ;;  %v3221_v16 = vld [vmem:[%s3194_s23 + $0x18] sm:$0xff]  ;;  %v3228_v18 = vld [vmem:[%s3194_s23 + $0x20] sm:$0xff]  ;;  %v3233_v19 = vld [vmem:[%s3194_s23 + $0x28] sm:$0xff]  ;;  %s3778_s3 = sld [smem:[#allocation26_spill]] }
  0x5e   : > { %611 = vmatpush.msra.mxu0 %v575_v8  ;;  %v3238_v20 = vld [vmem:[%s3194_s23 + $0x30] sm:$0xff]  ;;  %v574_v21 = vld [vmem:[%s3194_s23 + $0x38] sm:$0xff]  ;;  %v2651_v26 = vld [vmem:[%s3737_s6] ss:$0 sm:$0xff]  ;;  %s552_s23 = scalar_lea.vmem [#allocation10], %s2391_s17  ;;  %s3779_s13 = sld [smem:[#allocation27_spill]] }
  0x5f   : > { %674 = vmatpush.msra.mxu1 %v626_v7  ;;  %2399 = vmatmul.msk.f32.vlgmr.msra.gmra.mxu0 %vm583_vm0, %v563_v9  ;;  %v705_v38 = vld [vmem:[%s3738_s7 + $0x20] sm:$0xff]  ;;  %v703_v40 = vld [vmem:[%s3738_s7 + $0x10] sm:$0xff]  ;;  %v702_v42 = vld [vmem:[%s3738_s7 + $0x8] sm:$0xff]  ;;  %s2250_s29 = sshll.u32 %s552_s23, 4  ;;  %s2251_s29 = int_to_ptr.vmem [resolvable:$true] %s2250_s29 }
  0x60   : > { %722 = vmatpush.msra.mxu2 %v705_v38  ;;  %v701_v44 = vld [vmem:[%s3738_s7] sm:$0xff] }
  0x61   : > { %675 = vmatpush.msra.mxu1 %v625_v10  ;;  %v752_v54 = vld [vmem:[%s3161_s24] sm:$0x1]  ;;  %v753_v62 = vld [vmem:[%s3161_s24 + $0x1] sm:$0x1]  ;;  %v754_v5 = vld [vmem:[%s3161_s24 + $0x2] sm:$0x1] }
  0x62   : > { %2403 = vmatmul.msk.f32.vlgmr.msra.gmra.mxu1 %vm635_vm1, %v3201_v11  ;;  %723 = vmatpush.msra.mxu2 %v704_v39  ;;  %vm756_vm3 = vcmp.gt.f32.partialorder %v752_v54, 0.0  ;;  %vm757_vm5 = vcmp.gt.f32.partialorder %v753_v62, 0.0  ;;  %vm758_vm6 = vcmp.gt.f32.partialorder %v754_v5, 0.0 }
  0x63   : > { %v760_v56 = vsel %vm756_vm3, 0.0, %v2942_v55  ;;  %v761_v63 = vsel %vm757_vm5, 0.0, %v2942_v55  ;;  %v762_v6 = vsel %vm758_vm6, 0.0, %v2942_v55 }
  0x64   : > { %724 = vmatpush.msra.mxu2 %v703_v40  ;;  %v3334_v57 = vperm.slane %v760_v56, 0  ;;  %v3339_v0 = vperm.slane %v761_v63, 0  ;;  %v3344_v7 = vperm.slane %v762_v6, 0 }
  0x66   : > { %725 = vmatpush.msra.mxu2 %v702_v42 }
  0x67   : > { %2400 = vmatmul.msk.f32.gmra.mxu0 %vm583_vm0, %v564_v12  ;;  %v755_v12 = vld [vmem:[%s3161_s24 + $0x3] sm:$0x1]  ;;  %s2249_s24 = scalar_lea.hbm %s3779_s13, %s2506_s19 }
  0x68   : > { %726 = vmatpush.msra.mxu2 %v701_v44  ;;  %vm759_vm7 = vcmp.gt.f32.partialorder %v755_v12, 0.0  ;;  %s2252_s17 = sshll.u32 %s2249_s24, 4  ;;  %s2253_s17 = int_to_ptr.hbm [resolvable:$true] %s2252_s17 }
  0x69   : > { %2411 = vmatmul.msk.f32.vlgmr.msra.gmra.mxu2 %vm635_vm1, %v3201_v11 }
  0x6a   : > { %2404 = vmatmul.msk.f32.gmra.mxu1 %vm635_vm1, %v3208_v13 }
  0x6f   : > { %2401 = vmatmul.msk.f32.gmra.mxu0 %vm583_vm0, %v565_v14 }
  0x71   : > { %2412 = vmatmul.msk.f32.gmra.mxu2 %vm635_vm1, %v3208_v13  ;;  %v763_v13 = vsel %vm759_vm7, 0.0, %v2942_v55 }
  0x72   : > { %2405 = vmatmul.msk.f32.gmra.mxu1 %vm635_vm1, %v3215_v15  ;;  %v3349_v14 = vperm.slane %v763_v13, 0 }
  0x77   : > { %2402 = vmatmul.msk.f32.gmra.mxu0 %vm583_vm0, %v566_v17 }
  0x79   : > { %2413 = vmatmul.msk.f32.gmra.mxu2 %vm635_vm1, %v3215_v15 }
  0x7a   : > { %2406 = vmatmul.msk.f32.gmra.mxu1 %vm635_vm1, %v3221_v16 }
  0x81   : > { %2414 = vmatmul.msk.f32.gmra.mxu2 %vm635_vm1, %v3221_v16 }
  0x82   : > { %2407 = vmatmul.msk.f32.gmra.mxu1 %vm635_vm1, %v3228_v18 }
  0x89   : > { %2415 = vmatmul.msk.f32.gmra.mxu2 %vm635_vm1, %v3228_v18 }
  0x8a   : > { %2408 = vmatmul.msk.f32.gmra.mxu1 %vm635_vm1, %v3233_v19 }
  0x91   : > { %2416 = vmatmul.msk.f32.gmra.mxu2 %vm635_vm1, %v3233_v19 }
  0x92   : > { %2409 = vmatmul.msk.f32.gmra.mxu1 %vm635_vm1, %v3238_v20 }
  0x99   : > { %2417 = vmatmul.msk.f32.gmra.mxu2 %vm635_vm1, %v3238_v20  ;;  %v2653_v20 = vld [vmem:[%s3739_s8] ss:$0 sm:$0xff] }
  0x9a   : > { %2410 = vmatmul.msk.f32.gmra.mxu1 %vm635_vm1, %v574_v21 }
  0xa1   : > { %2418 = vmatmul.msk.f32.gmra.mxu2 %vm635_vm1, %v574_v21 }
  0xdc   : > { %v613_v22 = vpop.f32.mrf.mxu0 }
  0xdd   : > { %v3260_v31 = vadd.f32 %v2652_v24, %v613_v22 }
  0xdf   : > { %v677_v23 = vpop.f32.mrf.mxu1 }
  0xe0   : > { %v3258_v30 = vadd.f32 %v2651_v26, %v677_v23 }
  0xe4   : > { %v616_v25 = vpop.f32.mrf.mxu0 }
  0xe5   : > { %v3250_v27 = vadd.f32 %v2652_v24, %v616_v25 }
  0xe7   : > { %v680_v28 = vpop.f32.mrf.mxu1  ;;  %1071 = vrot.lane.b32.xlu2 %v3250_v27, %s2941_s25 }
  0xe8   : > { %v3252_v29 = vadd.f32 %v2651_v26, %v680_v28 }
  0xea   : > { %2419 = vmatpush.xpose.msk.msrb.mxu1 %vm764_vm2, %v3252_v29 }
  0xec   : > { %v619_v46 = vpop.f32.mrf.mxu0  ;;  %v728_v19 = vpop.f32.mrf.mxu2 }
  0xed   : > { %v3300_v47 = vadd.f32 %v2652_v24, %v619_v46  ;;  %v3373_v22 = vadd.f32 %v2653_v20, %v728_v19 }
  0xee   : > { %2420 = vmatpush.xpose.msk.msrb.mxu1 %vm764_vm2, %v3258_v30 }
  0xef   : > { %v683_v32 = vpop.f32.mrf.mxu1 }
  0xf0   : > { %v3270_v35 = vadd.f32 %v2651_v26, %v683_v32 }
  0xf1   : > { %2421 = vmatmul.msk.f32.vlgmr.msrb.gmra.mxu1 %vm764_vm2, %v3260_v31 }
  0xf4   : > { %v622_v52 = vpop.f32.mrf.mxu0  ;;  %v731_v21 = vpop.f32.mrf.mxu2 }
  0xf5   : > { %v3316_v53 = vadd.f32 %v2652_v24, %v622_v52  ;;  %v3375_v23 = vadd.f32 %v2653_v20, %v731_v21 }
  0xf7   : > { %v686_v33 = vpop.f32.mrf.mxu1  ;;  %963 = vmatpush.msrb.mxu0 %v3375_v23 }
  0xf8   : > { %v3266_v34 = vadd.f32 %v2651_v26, %v686_v33 }
  0xf9   : > { %964 = vmatpush.msrb.mxu0 %v3373_v22 }
  0xfa   : > { %2422 = vmatpush.xpose.msk.msra.mxu3 %vm764_vm2, %v3266_v34 }
  0xfc   : > { %v734_v24 = vpop.f32.mrf.mxu2 }
  0xfd   : > { %v3379_v33 = vadd.f32 %v2653_v20, %v734_v24 }
  0xfe   : > { %2423 = vmatpush.xpose.msk.msra.mxu3 %vm764_vm2, %v3270_v35 }
  0xff   : > { %v689_v36 = vpop.f32.mrf.mxu1 }
 0x100   : > { %v3296_v45 = vadd.f32 %v2651_v26, %v689_v36 }
 0x101   : > { %2424 = vmatmul.msk.f32.vlgmr.msra.gmra.mxu3 %vm764_vm2, %v3250_v27 }
 0x104   : > { %v737_v28 = vpop.f32.mrf.mxu2 }
 0x105   : > { %v3381_v36 = vadd.f32 %v2653_v20, %v737_v28 }
 0x107   : > { %v692_v41 = vpop.f32.mrf.mxu1 }
 0x108   : > { %v3291_v43 = vadd.f32 %v2651_v26, %v692_v41 }
 0x10a   : > { %2425 = vmatpush.xpose.msk.msrb.mxu3 %vm764_vm2, %v3291_v43 }
 0x10c   : > { %v740_v37 = vpop.f32.mrf.mxu2 }
 0x10d   : > { %v3386_v41 = vadd.f32 %v2653_v20, %v740_v37 }
 0x10e   : > { %2426 = vmatpush.xpose.msk.msrb.mxu3 %vm764_vm2, %v3296_v45 }
 0x10f   : > { %v695_v48 = vpop.f32.mrf.mxu1 }
 0x110   : > { %v3312_v51 = vadd.f32 %v2651_v26, %v695_v48 }
 0x111   : > { %2427 = vmatmul.msk.f32.vlgmr.msrb.gmra.mxu3 %vm764_vm2, %v3300_v47 }
 0x114   : > { %v743_v40 = vpop.f32.mrf.mxu2 }
 0x115   : > { %v3388_v42 = vadd.f32 %v2653_v20, %v743_v40 }
 0x117   : > { %v698_v49 = vpop.f32.mrf.mxu1  ;;  %1009 = vmatpush.msra.mxu0 %v3388_v42 }
 0x118   : > { %v3310_v50 = vadd.f32 %v2651_v26, %v698_v49 }
 0x119   : > { %1010 = vmatpush.msra.mxu0 %v3386_v41 }
 0x11a   : > { %2428 = vmatpush.xpose.msk.msra.mxu3 %vm764_vm2, %v3310_v50 }
 0x11c   : > { %v746_v49 = vpop.f32.mrf.mxu2 }
 0x11e   : > { %2429 = vmatpush.xpose.msk.msra.mxu3 %vm764_vm2, %v3312_v51 }
 0x121   : > { %2430 = vmatmul.msk.f32.vlgmr.msra.gmra.mxu3 %vm764_vm2, %v3316_v53 }
 0x122   : > { %986 = vmatpush.msrb.mxu3 %v3381_v36 }
 0x124   : > { %987 = vmatpush.msrb.mxu3 %v3379_v33  ;;  %v749_v55 = vpop.f32.mrf.mxu2 }
 0x125   : > { %v750_v56 = vadd.f32 %v2653_v20, %v749_v55 }
 0x127   : > { %1032 = vmatpush.msra.mxu3 %v750_v56 }
 0x16e   : > { %v791_v58 = vpop.f32.mrf.mxu1 }
 0x16f   : > { %v881_v59 = vmul.f32 0.35355338, %v791_v58  ;;  %v747_v58 = vadd.f32 %v2653_v20, %v746_v49 }
 0x171   : > { %v897_v60 = vadd.f32 %v3334_v57, %v881_v59  ;;  %1033 = vmatpush.msra.mxu3 %v747_v58 }
 0x173   : > { %v902_v61 = vsel %vm901_vm4, %v897_v60, -inf }
 0x174   : > { %903 = vmax.xlane.f32.xlu1 %v902_v61 }
 0x184   : > { %v820_v1 = vpop.f32.mrf.mxu3 }
 0x185   : > { %v882_v2 = vmul.f32 0.35355338, %v820_v1  ;;  %v3396_v1 = vpack.i.bf16 %v747_v58, %v750_v56 }
 0x187   : > { %v898_v3 = vadd.f32 %v3339_v0, %v882_v2 }
 0x189   : > { %v905_v4 = vsel %vm901_vm4, %v898_v3, -inf }
 0x18a   : > { %906 = vmax.xlane.f32.xlu0 %v905_v4 }
 0x194   : > { %v849_v8 = vpop.f32.mrf.mxu3 }
 0x195   : > { %v883_v9 = vmul.f32 0.35355338, %v849_v8 }
 0x197   : > { %v899_v10 = vadd.f32 %v3344_v7, %v883_v9  ;;  %v1072_v9 = vpop.permute.xlu2 %1071 }
 0x199   : > { %v908_v11 = vsel %vm901_vm4, %v899_v10, -inf }
 0x19a   : > { %909 = vmax.xlane.f32.xlu1 %v908_v11 }
 0x1a4   : > { %v878_v15 = vpop.f32.mrf.mxu3 }
 0x1a5   : > { %v884_v16 = vmul.f32 0.35355338, %v878_v15 }
 0x1a7   : > { %v3352_v17 = vadd.f32 %v3349_v14, %v884_v16 }
 0x1a9   : > { %v911_v18 = vsel %vm901_vm4, %v3352_v17, -inf }
 0x1aa   : > { %912 = vmax.xlane.f32.xlu0 %v911_v18 }
 0x1b3   : > { %1073 = vrot.lane.b32.xlu1 %v3270_v35, %s2941_s25 }
 0x1bb   : > { %1137 = vrot.lane.b32.xlu1 %v3312_v51, %s2941_s25 }
 0x1be   : > { %1075 = vrot.lane.b32.xlu0 %v3266_v34, %s2941_s25 }
 0x1c3   : > { %1043 = vrot.lane.b32.xlu1 %v3252_v29, %s2941_s25 }
 0x1c6   : > { %1139 = vrot.lane.b32.xlu0 %v3310_v50, %s2941_s25 }
 0x1cb   : > { %1039 = vrot.lane.b32.xlu1 %v3260_v31, %s2941_s25 }
 0x1d3   : > { %1105 = vrot.lane.b32.xlu1 %v3296_v45, %s2941_s25 }
 0x1e7   : > { %v904_v25 = vpop.xlane.xlu1 %903 }
 0x1e8   : > { %v914_v26 = vsub.f32 %v897_v60, %v904_v25 }
 0x1ea   : > { %v918_v32 = vmul.f32 1.442695, %v914_v26 }
 0x1ec   : > { %2657 = vpow2.f32 %v918_v32 }
 0x1f2   : > { %v2658_v38 = vpop.eup %2657 }
 0x1f3   : > { %v926_v39 = vsel %vm901_vm4, %v2658_v38, 0.0 }
 0x1f4   : > { %927 = vadd.xlane.f32.xlu2 %v926_v39 }
 0x1fd   : > { %v907_v44 = vpop.xlane.xlu0 %906 }
 0x1fe   : > { %v915_v46 = vsub.f32 %v898_v3, %v907_v44 }
 0x200   : > { %v920_v48 = vmul.f32 1.442695, %v915_v46 }
 0x202   : > { %2659 = vpow2.f32 %v920_v48 }
 0x208   : > { %v2660_v52 = vpop.eup %2659 }
 0x209   : > { %v929_v54 = vsel %vm901_vm4, %v2660_v52, 0.0 }
 0x20a   : > { %930 = vadd.xlane.f32.xlu2 %v929_v54 }
 0x20d   : > { %v910_v59 = vpop.xlane.xlu1 %909 }
 0x20e   : > { %v916_v60 = vsub.f32 %v899_v10, %v910_v59 }
 0x210   : > { %v922_v61 = vmul.f32 1.442695, %v916_v60 }
 0x212   : > { %2661 = vpow2.f32 %v922_v61 }
 0x218   : > { %v2662_v62 = vpop.eup %2661 }
 0x219   : > { %v932_v63 = vsel %vm901_vm4, %v2662_v62, 0.0 }
 0x21a   : > { %933 = vadd.xlane.f32.xlu0 %v932_v63 }
 0x21d   : > { %v913_v2 = vpop.xlane.xlu0 %912 }
 0x21e   : > { %v917_v3 = vsub.f32 %v3352_v17, %v913_v2 }
 0x220   : > { %v924_v4 = vmul.f32 1.442695, %v917_v3 }
 0x222   : > { %1135 = vrot.lane.b32.xlu2 %v3316_v53, %s2941_s25  ;;  %2663 = vpow2.f32 %v924_v4 }
 0x225   : > { %v1074_v8 = vpop.permute.xlu1 %1073 }
 0x228   : > { %v2664_v5 = vpop.eup %2663 }
 0x229   : > { %v935_v6 = vsel %vm901_vm4, %v2664_v5, 0.0 }
 0x22d   : > { %v1138_v10 = vpop.permute.xlu1 %1137 }
 0x22e   : > { %2592 = vrot.lane.b32.xlu0 %v3396_v1, %s2941_s25 }
 0x230   : > { %v1076_v16 = vpop.permute.xlu0 %1075 }
 0x235   : > { %v1044_v15 = vpop.permute.xlu1 %1043 }
 0x236   : > { %1462 = vrot.lane.b32.xlu0 %v3266_v34, %s2943_s14 }
 0x238   : > { %v1140_v19 = vpop.permute.xlu0 %1139 }
 0x23d   : > { %v1040_v48 = vpop.permute.xlu1 %1039 }
 0x23e   : > { %1526 = vrot.lane.b32.xlu0 %v3310_v50, %s2943_s14 }
 0x24b   : > { %936 = vadd.xlane.f32.xlu2 %v935_v6 }
 0x263   : > { %1041 = vrot.lane.b32.xlu2 %v3258_v30, %s2941_s25 }
 0x267   : > { %v928_v11 = vpop.xlane.xlu2 %927 }
 0x268   : > { %2665 = vrcp.f32 %v928_v11 }
 0x26b   : > { %1107 = vrot.lane.b32.xlu2 %v3291_v43, %s2941_s25 }
 0x26e   : > { %v2666_v12 = vpop.eup %2665 }
 0x26f   : > { %v942_v13 = vmul.f32 %v2666_v12, %v2658_v38 }
 0x271   : > { %2431 = vmatmul.msk.f32.vlgmr.msrb.gmra.mxu0 %vm901_vm4, %v942_v13 }
 0x272   : > { %2435 = vmatpush.xpose.msk.msrb.mxu0 %vm764_vm2, %v1044_v15 }
 0x273   : > { %1103 = vrot.lane.b32.xlu2 %v3300_v47, %s2941_s25 }
 0x27d   : > { %v931_v17 = vpop.xlane.xlu2 %930 }
 0x27e   : > { %2667 = vrcp.f32 %v931_v17 }
 0x284   : > { %v2668_v18 = vpop.eup %2667 }
 0x285   : > { %v943_v20 = vmul.f32 %v2668_v18, %v2660_v52  ;;  %v1136_v38 = vpop.permute.xlu2 %1135  ;;  %v1106_v52 = vpop.permute.xlu1 %1105 }
 0x287   : > { %2432 = vmatmul.msk.f32.vlgmr.msrb.gmra.mxu3 %vm901_vm4, %v943_v20 }
 0x288   : > { %2438 = vmatpush.xpose.msk.msrb.mxu3 %vm764_vm2, %v1076_v16 }
 0x28c   : > { %2439 = vmatpush.xpose.msk.msrb.mxu3 %vm764_vm2, %v1074_v8 }
 0x28d   : > { %v934_v21 = vpop.xlane.xlu0 %933 }
 0x28e   : > { %2669 = vrcp.f32 %v934_v21 }
 0x294   : > { %v2670_v24 = vpop.eup %2669 }
 0x295   : > { %v944_v25 = vmul.f32 %v2670_v24, %v2662_v62 }
 0x297   : > { %2433 = vmatmul.msk.f32.vlgmr.msra.gmra.mxu0 %vm901_vm4, %v944_v25 }
 0x2a0   : > { %v2593_v26 = vpop.permute.xlu0 %2592 }
 0x2a1   : > { %v2594_v28 = vunpack.i.l.bf16 %v2593_v26  ;;  %v2595_v32 = vunpack.i.h.bf16 %v2593_v26 }
 0x2a3   : > { %1337 = vmatpush.msrb.mxu2 %v2594_v28 }
 0x2a5   : > { %1338 = vmatpush.msrb.mxu2 %v2595_v32 }
 0x2a8   : > { %v1463_v37 = vpop.permute.xlu0 %1462 }
 0x2a9   : > { %2462 = vmatpush.xpose.msk.msra.mxu2 %vm764_vm2, %v1463_v37 }
 0x2be   : > { %v937_v39 = vpop.xlane.xlu2 %936 }
 0x2bf   : > { %2671 = vrcp.f32 %v937_v39 }
 0x2c5   : > { %v2672_v40 = vpop.eup %2671 }
 0x2c6   : > { %v945_v44 = vmul.f32 %v2672_v40, %v2664_v5  ;;  %v1042_v46 = vpop.permute.xlu2 %1041 }
 0x2c7   : > { %2436 = vmatpush.xpose.msk.msrb.mxu0 %vm764_vm2, %v1042_v46 }
 0x2c8   : > { %2434 = vmatmul.msk.f32.vlgmr.msra.gmra.mxu3 %vm901_vm4, %v945_v44 }
 0x2c9   : > { %2444 = vmatpush.xpose.msk.msra.mxu3 %vm764_vm2, %v1140_v19 }
 0x2ca   : > { %2437 = vmatmul.msk.f32.vlgmr.msrb.gmra.mxu0 %vm764_vm2, %v1040_v48 }
 0x2cd   : > { %2445 = vmatpush.xpose.msk.msra.mxu3 %vm764_vm2, %v1138_v10  ;;  %v3467_v10 = vpack.i.bf16 %v3379_v33, %v3381_v36 }
 0x2ce   : > { %v1108_v49 = vpop.permute.xlu2 %1107 }
 0x2cf   : > { %2441 = vmatpush.xpose.msk.msra.mxu0 %vm764_vm2, %v1108_v49 }
 0x2d0   : > { %2440 = vmatmul.msk.f32.vlgmr.msrb.gmra.mxu3 %vm764_vm2, %v1072_v9  ;;  %v3455_v9 = vpack.i.bf16 %v3386_v41, %v3388_v42 }
 0x2d3   : > { %2442 = vmatpush.xpose.msk.msra.mxu0 %vm764_vm2, %v1106_v52 }
 0x2d6   : > { %v1104_v54 = vpop.permute.xlu2 %1103 }
 0x2d7   : > { %2443 = vmatmul.msk.f32.vlgmr.msra.gmra.mxu0 %vm764_vm2, %v1104_v54 }
 0x2d8   : > { %2446 = vmatmul.msk.f32.vlgmr.msra.gmra.mxu3 %vm764_vm2, %v1136_v38 }
 0x2ee   : > { %v3429_v55 = vpop.f32.mrf.mxu0 }
 0x30a   : > { %v3431_v56 = vpop.f32.mrf.mxu3 }
 0x314   : > { %v3433_v58 = vpop.f32.mrf.mxu0 }
 0x347   : > { %v3437_v60 = vpop.f32.mrf.mxu0 }
 0x34b   : > { %v3435_v59 = vpop.f32.mrf.mxu3 }
 0x353   : > { %v1100_v61 = vpop.f32.mrf.mxu3 }
 0x354   : > { %v1132_v62 = vpop.f32.mrf.mxu0  ;;  %v1168_v41 = vmul.f32 0.35355338, %v1100_v61 }
 0x355   : > { %v1169_v63 = vmul.f32 0.35355338, %v1132_v62 }
 0x356   : > { %v1172_v42 = vadd.f32 %v1168_v41, %v3339_v0 }
 0x357   : > { %v1173_v2 = vadd.f32 %v1169_v63, %v3344_v7 }
 0x358   : > { %v1178_v11 = vsel %vm901_vm4, %v1172_v42, -inf }
 0x359   : > { %v1181_v3 = vsel %vm901_vm4, %v1173_v2, -inf }
 0x35a   : > { %1182 = vmax.xlane.f32.xlu2 %v1181_v3  ;;  %v1527_v3 = vpop.permute.xlu0 %1526 }
 0x35b   : > { %v1164_v4 = vpop.f32.mrf.mxu3 }
 0x35c   : > { %v1170_v5 = vmul.f32 0.35355338, %v1164_v4 }
 0x35e   : > { %v1174_v6 = vadd.f32 %v1170_v5, %v3349_v14 }
 0x360   : > { %v1184_v8 = vsel %vm901_vm4, %v1174_v6, -inf }
 0x361   : > { %1185 = vmax.xlane.f32.xlu1 %v1184_v8 }
 0x372   : > { %1458 = vrot.lane.b32.xlu2 %v3250_v27, %s2943_s14 }
 0x37a   : > { %1460 = vrot.lane.b32.xlu1 %v3270_v35, %s2943_s14  ;;  %1522 = vrot.lane.b32.xlu2 %v3316_v53, %s2943_s14 }
 0x382   : > { %1524 = vrot.lane.b32.xlu1 %v3312_v51, %s2943_s14  ;;  %1430 = vrot.lane.b32.xlu2 %v3252_v29, %s2943_s14 }
 0x38a   : > { %2597 = vrot.lane.b32.xlu1 %v3455_v9, %s2941_s25  ;;  %1426 = vrot.lane.b32.xlu2 %v3260_v31, %s2943_s14 }
 0x392   : > { %1428 = vrot.lane.b32.xlu1 %v3258_v30, %s2943_s14  ;;  %1492 = vrot.lane.b32.xlu2 %v3296_v45, %s2943_s14 }
 0x39a   : > { %1494 = vrot.lane.b32.xlu1 %v3291_v43, %s2943_s14  ;;  %2602 = vrot.lane.b32.xlu2 %v3467_v10, %s2941_s25 }
 0x3c4   : > { %1179 = vmax.xlane.f32.xlu1 %v1178_v11 }
 0x3cd   : > { %v1183_v12 = vpop.xlane.xlu2 %1182 }
 0x3ce   : > { %v1189_v17 = vsub.f32 %v1173_v2, %v1183_v12 }
 0x3d0   : > { %v1195_v33 = vmul.f32 1.442695, %v1189_v17 }
 0x3d4   : > { %v1186_v13 = vpop.xlane.xlu1 %1185 }
 0x3d5   : > { %v1190_v15 = vsub.f32 %v1174_v6, %v1186_v13  ;;  %v1459_v16 = vpop.permute.xlu2 %1458 }
 0x3d7   : > { %v1197_v18 = vmul.f32 1.442695, %v1190_v15  ;;  %v1038_v15 = vld [vmem:[#allocation8] sm:$0xff] }
 0x3d9   : > { %2673 = vpow2.f32 %v1197_v18 }
 0x3da   : > { %2675 = vpow2.f32 %v1195_v33 }
 0x3dd   : > { %v1523_v36 = vpop.permute.xlu2 %1522 }
 0x3df   : > { %v2674_v19 = vpop.eup %2673 }
 0x3e0   : > { %v1208_v20 = vsel %vm901_vm4, %v2674_v19, 0.0  ;;  %v2676_v21 = vpop.eup %2675 }
 0x3e1   : > { %1209 = vadd.xlane.f32.xlu0 %v1208_v20  ;;  %v1205_v25 = vsel %vm901_vm4, %v2676_v21, 0.0 }
 0x3e5   : > { %v1431_v24 = vpop.permute.xlu2 %1430 }
 0x3e9   : > { %1206 = vadd.xlane.f32.xlu0 %v1205_v25 }
 0x3ec   : > { %v1461_v26 = vpop.permute.xlu1 %1460 }
 0x3ed   : > { %v1427_v28 = vpop.permute.xlu2 %1426  ;;  %2463 = vmatpush.xpose.msk.msra.mxu2 %vm764_vm2, %v1461_v26 }
 0x3f4   : > { %v1525_v32 = vpop.permute.xlu1 %1524 }
 0x3f5   : > { %v1493_v37 = vpop.permute.xlu2 %1492 }
 0x3fc   : > { %v2598_v38 = vpop.permute.xlu1 %2597 }
 0x3fd   : > { %v2599_v39 = vunpack.i.l.bf16 %v2598_v38  ;;  %v2603_v40 = vpop.permute.xlu2 %2602  ;;  %1490 = vrot.lane.b32.xlu0 %v3300_v47, %s2943_s14  ;;  %v2600_v46 = vunpack.i.h.bf16 %v2598_v38 }
 0x3fe   : > { %v2604_v44 = vunpack.i.l.bf16 %v2603_v40  ;;  %v2605_v48 = vunpack.i.h.bf16 %v2603_v40 }
 0x3ff   : > { %1306 = vmatpush.msra.mxu1 %v2599_v39 }
 0x400   : > { %1275 = vmatpush.msrb.mxu3 %v2604_v44  ;;  %v3520_v44 = vpack.i.bf16 %v3373_v22, %v3375_v23 }
 0x401   : > { %1307 = vmatpush.msra.mxu1 %v2600_v46 }
 0x402   : > { %1276 = vmatpush.msrb.mxu3 %v2605_v48 }
 0x403   : > { %2459 = vmatpush.xpose.msk.msrb.mxu1 %vm764_vm2, %v1431_v24 }
 0x404   : > { %v1429_v49 = vpop.permute.xlu1 %1428  ;;  %1412 = vmatpush.msra.mxu3 %v1038_v15 }
 0x405   : > { %2607 = vrot.lane.b32.xlu0 %v3467_v10, %s2943_s14 }
 0x407   : > { %2460 = vmatpush.xpose.msk.msrb.mxu1 %vm764_vm2, %v1429_v49 }
 0x40c   : > { %v1495_v52 = vpop.permute.xlu1 %1494 }
 0x40d   : > { %1836 = vrot.lane.b32.xlu0 %v3291_v43, %s2944_s20 }
 0x437   : > { %v1180_v54 = vpop.xlane.xlu1 %1179 }
 0x438   : > { %v1188_v61 = vsub.f32 %v1172_v42, %v1180_v54 }
 0x43a   : > { %v1193_v62 = vmul.f32 1.442695, %v1188_v61 }
 0x43c   : > { %2677 = vpow2.f32 %v1193_v62 }
 0x442   : > { %v2678_v63 = vpop.eup %2677 }
 0x443   : > { %v1202_v2 = vsel %vm901_vm4, %v2678_v63, 0.0 }
 0x444   : > { %1203 = vadd.xlane.f32.xlu1 %v1202_v2 }
 0x454   : > { %v1210_v4 = vpop.xlane.xlu0 %1209 }
 0x455   : > { %2679 = vrcp.f32 %v1210_v4 }
 0x45b   : > { %v2680_v5 = vpop.eup %2679 }
 0x45c   : > { %v1207_v6 = vpop.xlane.xlu0 %1206  ;;  %v1218_v8 = vmul.f32 %v2680_v5, %v2674_v19 }
 0x45d   : > { %2681 = vrcp.f32 %v1207_v6 }
 0x45e   : > { %2450 = vmatmul.msk.f32.vlgmr.msrb.gmra.mxu2 %vm901_vm4, %v1218_v8 }
 0x45f   : > { %2468 = vmatpush.xpose.msk.msrb.mxu2 %vm764_vm2, %v1527_v3 }
 0x463   : > { %v2682_v43 = vpop.eup %2681  ;;  %2469 = vmatpush.xpose.msk.msrb.mxu2 %vm764_vm2, %v1525_v32 }
 0x464   : > { %v1217_v41 = vmul.f32 %v2682_v43, %v2676_v21 }
 0x466   : > { %2449 = vmatmul.msk.f32.vlgmr.msra.gmra.mxu1 %vm901_vm4, %v1217_v41  ;;  %2464 = vmatmul.msk.f32.vlgmr.msra.gmra.mxu2 %vm764_vm2, %v1459_v16 }
 0x467   : > { %2465 = vmatpush.xpose.msk.msra.mxu1 %vm764_vm2, %v1495_v52 }
 0x46b   : > { %2466 = vmatpush.xpose.msk.msra.mxu1 %vm764_vm2, %v1493_v37 }
 0x46e   : > { %2461 = vmatmul.msk.f32.vlgmr.msrb.gmra.mxu1 %vm764_vm2, %v1427_v28  ;;  %2470 = vmatmul.msk.f32.vlgmr.msrb.gmra.mxu2 %vm764_vm2, %v1523_v36 }
 0x46f   : > { %v1491_v42 = vpop.permute.xlu0 %1490 }
 0x476   : > { %2467 = vmatmul.msk.f32.vlgmr.msra.gmra.mxu1 %vm764_vm2, %v1491_v42 }
 0x477   : > { %v2608_v11 = vpop.permute.xlu0 %2607 }
 0x478   : > { %v2609_v12 = vunpack.i.l.bf16 %v2608_v11  ;;  %v2610_v13 = vunpack.i.h.bf16 %v2608_v11 }
 0x47a   : > { %1658 = vmatpush.msra.mxu2 %v2609_v12 }
 0x47c   : > { %1659 = vmatpush.msra.mxu2 %v2610_v13 }
 0x4b7   : > { %v1204_v17 = vpop.xlane.xlu1 %1203 }
 0x4b8   : > { %2683 = vrcp.f32 %v1204_v17 }
 0x4be   : > { %v2684_v16 = vpop.eup %2683 }
 0x4bf   : > { %v1216_v18 = vmul.f32 %v2684_v16, %v2678_v63 }
 0x4c1   : > { %2448 = vmatmul.msk.f32.vlgmr.msrb.gmra.mxu3 %vm901_vm4, %v1216_v18 }
 0x4c9   : > { %2455 = vmatmul.msk.f32.vlgmr.msra.gmra.mxu3 %vm764_vm2, %v3429_v55 }
 0x4d1   : > { %2456 = vmatmul.msk.f32.gmra.mxu3 %vm764_vm2, %v3431_v56 }
 0x4d9   : > { %2457 = vmatmul.msk.f32.gmra.mxu3 %vm764_vm2, %v3433_v58 }
 0x4e1   : > { %v3504_v33 = vpop.f32.mrf.mxu2  ;;  %2458 = vmatmul.msk.f32.gmra.mxu3 %vm764_vm2, %v3435_v59 }
 0x4e3   : > { %v3508_v36 = vpop.f32.mrf.mxu1 }
 0x4e9   : > { %v1487_v19 = vpop.f32.mrf.mxu2 }
 0x4ea   : > { %v1555_v37 = vmul.f32 0.35355338, %v1487_v19 }
 0x4eb   : > { %v1455_v20 = vpop.f32.mrf.mxu1 }
 0x4ec   : > { %v1554_v21 = vmul.f32 0.35355338, %v1455_v20  ;;  %v1559_v39 = vadd.f32 %v1555_v37, %v3339_v0 }
 0x4ee   : > { %v1558_v24 = vadd.f32 %v1554_v21, %v3334_v57  ;;  %v1565_v40 = vsel %vm901_vm4, %v1559_v39, -inf }
 0x4f0   : > { %v1562_v55 = vsel %vm901_vm4, %v1558_v24, -inf }
 0x4f1   : > { %v1551_v25 = vpop.f32.mrf.mxu2  ;;  %1563 = vmax.xlane.f32.xlu1 %v1562_v55 }
 0x4f2   : > { %v1557_v56 = vmul.f32 0.35355338, %v1551_v25 }
 0x4f3   : > { %v1519_v26 = vpop.f32.mrf.mxu1 }
 0x4f4   : > { %v1556_v28 = vmul.f32 0.35355338, %v1519_v26  ;;  %v1561_v58 = vadd.f32 %v1557_v56, %v3349_v14 }
 0x4f6   : > { %v1571_v32 = vsel %vm901_vm4, %v1561_v58, -inf  ;;  %v1560_v59 = vadd.f32 %v1556_v28, %v3344_v7 }
 0x4f7   : > { %1572 = vmax.xlane.f32.xlu0 %v1571_v32 }
 0x4f8   : > { %v1568_v38 = vsel %vm901_vm4, %v1560_v59, -inf }
 0x4f9   : > { %1569 = vmax.xlane.f32.xlu2 %v1568_v38 }
 0x501   : > { %1566 = vmax.xlane.f32.xlu2 %v1565_v40 }
 0x50a   : > { %2617 = vrot.lane.b32.xlu1 %v3520_v44, %s2943_s14 }
 0x50b   : > { %1834 = vrot.lane.b32.xlu0 %v3296_v45, %s2944_s20 }
 0x512   : > { %2622 = vrot.lane.b32.xlu1 %v3455_v9, %s2943_s14 }
 0x513   : > { %1772 = vrot.lane.b32.xlu0 %v3252_v29, %s2944_s20 }
 0x519   : > { %2612 = vrot.lane.b32.xlu2 %v3396_v1, %s2943_s14  ;;  %s2238_s14 = scalar_lea.sflag [#allocation4], %s3147_s21 }
 0x51a   : > { %1768 = vrot.lane.b32.xlu1 %v3260_v31, %s2944_s20 }
 0x51b   : > { %1832 = vrot.lane.b32.xlu0 %v3300_v47, %s2944_s20  ;;  %v3546_v47 = vpop.permute.xlu0 %1836 }
 0x522   : > { %1868 = vrot.lane.b32.xlu1 %v3310_v50, %s2944_s20 }
 0x523   : > { %1770 = vrot.lane.b32.xlu0 %v3258_v30, %s2944_s20 }
 0x52b   : > { %1804 = vrot.lane.b32.xlu0 %v3266_v34, %s2944_s20 }
 0x533   : > { %1866 = vrot.lane.b32.xlu0 %v3312_v51, %s2944_s20 }
 0x53b   : > { %1864 = vrot.lane.b32.xlu0 %v3316_v53, %s2944_s20 }
 0x544   : > { %v3567_v28 = vpop.f32.mrf.mxu3 }
 0x54c   : > { %v3572_v38 = vpop.f32.mrf.mxu3 }
 0x564   : > { %v1564_v29 = vpop.xlane.xlu1 %1563 }
 0x565   : > { %v1574_v31 = vsub.f32 %v1558_v24, %v1564_v29 }
 0x567   : > { %v1578_v45 = vmul.f32 1.442695, %v1574_v31  ;;  %v3578_v31 = vpop.f32.mrf.mxu3 }
 0x569   : > { %2685 = vpow2.f32 %v1578_v45 }
 0x56a   : > { %v1573_v34 = vpop.xlane.xlu0 %1572 }
 0x56b   : > { %v1577_v52 = vsub.f32 %v1561_v58, %v1573_v34 }
 0x56c   : > { %v1570_v22 = vpop.xlane.xlu2 %1569 }
 0x56d   : > { %v1576_v50 = vsub.f32 %v1560_v59, %v1570_v22  ;;  %v1584_v61 = vmul.f32 1.442695, %v1577_v52 }
 0x56f   : > { %v2686_v23 = vpop.eup %2685  ;;  %v1582_v46 = vmul.f32 1.442695, %v1576_v50  ;;  %v3583_v50 = vpop.f32.mrf.mxu3 }
 0x570   : > { %v1586_v30 = vsel %vm901_vm4, %v2686_v23, 0.0 }
 0x571   : > { %2687 = vpow2.f32 %v1582_v46  ;;  %1587 = vadd.xlane.f32.xlu1 %v1586_v30 }
 0x574   : > { %v1567_v48 = vpop.xlane.xlu2 %1566 }
 0x575   : > { %v1575_v51 = vsub.f32 %v1559_v39, %v1567_v48 }
 0x577   : > { %v2688_v49 = vpop.eup %2687  ;;  %v1580_v53 = vmul.f32 1.442695, %v1575_v51 }
 0x578   : > { %v1592_v54 = vsel %vm901_vm4, %v2688_v49, 0.0 }
 0x579   : > { %2689 = vpow2.f32 %v1580_v53  ;;  %1593 = vadd.xlane.f32.xlu2 %v1592_v54 }
 0x57a   : > { %2691 = vpow2.f32 %v1584_v61 }
 0x57c   : > { %v2618_v62 = vpop.permute.xlu1 %2617  ;;  %v2613_v63 = vpop.permute.xlu2 %2612 }
 0x57d   : > { %v2619_v2 = vunpack.i.l.bf16 %v2618_v62  ;;  %v2614_v3 = vunpack.i.l.bf16 %v2613_v63  ;;  %v3550_v4 = vpop.permute.xlu0 %1834  ;;  %v2620_v6 = vunpack.i.h.bf16 %v2618_v62  ;;  %v2615_v8 = vunpack.i.h.bf16 %v2613_v63 }
 0x57f   : > { %v2690_v5 = vpop.eup %2689  ;;  %1629 = vmatpush.msrb.mxu1 %v2619_v2  ;;  %1716 = vmatpush.msrb.mxu2 %v2614_v3 }
 0x580   : > { %v1589_v43 = vsel %vm901_vm4, %v2690_v5, 0.0  ;;  %v2692_v42 = vpop.eup %2691 }
 0x581   : > { %1630 = vmatpush.msrb.mxu1 %v2620_v6  ;;  %1590 = vadd.xlane.f32.xlu1 %v1589_v43  ;;  %v1595_v15 = vsel %vm901_vm4, %v2692_v42, 0.0 }
 0x582   : > { %1717 = vmatpush.msrb.mxu2 %v2615_v8 }
 0x584   : > { %v2623_v41 = vpop.permute.xlu1 %2622 }
 0x585   : > { %v2624_v11 = vunpack.i.l.bf16 %v2623_v41  ;;  %v1773_v12 = vpop.permute.xlu0 %1772  ;;  %v2625_v13 = vunpack.i.h.bf16 %v2623_v41 }
 0x586   : > { %2479 = vmatpush.xpose.msk.msrb.mxu3 %vm764_vm2, %v1773_v12 }
 0x587   : > { %1687 = vmatpush.msra.mxu1 %v2624_v11 }
 0x589   : > { %1688 = vmatpush.msra.mxu1 %v2625_v13  ;;  %1596 = vadd.xlane.f32.xlu1 %v1595_v15 }
 0x58c   : > { %v1769_v17 = vpop.permute.xlu1 %1768 }
 0x58d   : > { %v1833_v16 = vpop.permute.xlu0 %1832 }
 0x591   : > { %1802 = vrot.lane.b32.xlu2 %v3270_v35, %s2944_s20  ;;  %v1167_v35 = vmul.f32 0.35355338, %v3437_v60 }
 0x593   : > { %v1171_v55 = vadd.f32 %v1167_v35, %v3334_v57 }
 0x594   : > { %v1869_v19 = vpop.permute.xlu1 %1868 }
 0x595   : > { %v1771_v18 = vpop.permute.xlu0 %1770  ;;  %v1175_v25 = vsel %vm901_vm4, %v1171_v55, -inf }
 0x596   : > { %2480 = vmatpush.xpose.msk.msrb.mxu3 %vm764_vm2, %v1771_v18 }
 0x599   : > { %2481 = vmatmul.msk.f32.vlgmr.msrb.gmra.mxu3 %vm764_vm2, %v1769_v17 }
 0x59a   : > { %2488 = vmatpush.xpose.msk.msra.mxu3 %vm764_vm2, %v1869_v19 }
 0x59d   : > { %v1805_v20 = vpop.permute.xlu0 %1804 }
 0x5a2   : > { %1800 = vrot.lane.b32.xlu1 %v3250_v27, %s2944_s20 }
 0x5a5   : > { %v1867_v21 = vpop.permute.xlu0 %1866 }
 0x5a6   : > { %2489 = vmatpush.xpose.msk.msra.mxu3 %vm764_vm2, %v1867_v21 }
 0x5ad   : > { %v1865_v24 = vpop.permute.xlu0 %1864 }
 0x5ae   : > { %2490 = vmatmul.msk.f32.vlgmr.msra.gmra.mxu3 %vm764_vm2, %v1865_v24 }
 0x5cc   : > { %1176 = vmax.xlane.f32.xlu1 %v1175_v25 }
 0x5e4   : > { %v1588_v56 = vpop.xlane.xlu1 %1587 }
 0x5e5   : > { %2693 = vrcp.f32 %v1588_v56 }
 0x5eb   : > { %v2694_v26 = vpop.eup %2693 }
 0x5ec   : > { %v1602_v58 = vmul.f32 %v2694_v26, %v2686_v23  ;;  %v1594_v27 = vpop.xlane.xlu2 %1593  ;;  %v3586_v23 = vpop.f32.mrf.mxu3 }
 0x5ed   : > { %2695 = vrcp.f32 %v1594_v27 }
 0x5ee   : > { %2471 = vmatmul.msk.f32.vlgmr.msrb.gmra.mxu1 %vm901_vm4, %v1602_v58 }
 0x5ef   : > { %2482 = vmatpush.xpose.msk.msrb.mxu1 %vm764_vm2, %v1805_v20 }
 0x5f3   : > { %v2696_v32 = vpop.eup %2695 }
 0x5f4   : > { %v1604_v59 = vmul.f32 %v2696_v32, %v2688_v49  ;;  %v1591_v60 = vpop.xlane.xlu1 %1590  ;;  %v1803_v37 = vpop.permute.xlu2 %1802 }
 0x5f5   : > { %2697 = vrcp.f32 %v1591_v60  ;;  %2483 = vmatpush.xpose.msk.msrb.mxu1 %vm764_vm2, %v1803_v37 }
 0x5f6   : > { %2473 = vmatmul.msk.f32.vlgmr.msra.gmra.mxu1 %vm901_vm4, %v1604_v59 }
 0x5fb   : > { %v2698_v39 = vpop.eup %2697 }
 0x5fc   : > { %v1603_v40 = vmul.f32 %v2698_v39, %v2690_v5  ;;  %v1597_v29 = vpop.xlane.xlu1 %1596 }
 0x5fd   : > { %2699 = vrcp.f32 %v1597_v29 }
 0x5fe   : > { %2472 = vmatmul.msk.f32.vlgmr.msra.gmra.mxu2 %vm901_vm4, %v1603_v40 }
 0x5ff   : > { %2485 = vmatpush.xpose.msk.msra.mxu2 %vm764_vm2, %v3546_v47 }
 0x603   : > { %v2700_v45 = vpop.eup %2699  ;;  %2486 = vmatpush.xpose.msk.msra.mxu2 %vm764_vm2, %v3550_v4 }
 0x604   : > { %v1605_v22 = vmul.f32 %v2700_v45, %v2692_v42 }
 0x606   : > { %2474 = vmatmul.msk.f32.vlgmr.msrb.gmra.mxu2 %vm901_vm4, %v1605_v22 }
 0x60e   : > { %2487 = vmatmul.msk.f32.vlgmr.msra.gmra.mxu2 %vm764_vm2, %v1833_v16 }
 0x614   : > { %v1801_v46 = vpop.permute.xlu1 %1800 }
 0x615   : > { %2484 = vmatmul.msk.f32.vlgmr.msrb.gmra.mxu1 %vm764_vm2, %v1801_v46 }
 0x61c   : > { %v1797_v30 = vpop.f32.mrf.mxu3 }
 0x61d   : > { %v1896_v47 = vmul.f32 0.35355338, %v1797_v30 }
 0x61f   : > { %v1900_v34 = vadd.f32 %v1896_v47, %v3334_v57 }
 0x621   : > { %v1904_v48 = vsel %vm901_vm4, %v1900_v34, -inf }
 0x622   : > { %1905 = vmax.xlane.f32.xlu2 %v1904_v48  ;;  %v1722_v48 = vld [vmem:[#allocation8 + $0x10] sm:$0xff] }
 0x631   : > { %v1893_v51 = vpop.f32.mrf.mxu3 }
 0x632   : > { %v1899_v49 = vmul.f32 0.35355338, %v1893_v51 }
 0x634   : > { %v1903_v52 = vadd.f32 %v1899_v49, %v3349_v14 }
 0x636   : > { %v1913_v53 = vsel %vm901_vm4, %v1903_v52, -inf }
 0x637   : > { %1914 = vmax.xlane.f32.xlu1 %v1913_v53 }
 0x63a   : > { %2627 = vrot.lane.b32.xlu2 %v3520_v44, %s2941_s25 }
 0x63f   : > { %v1177_v54 = vpop.xlane.xlu1 %1176 }
 0x640   : > { %v1187_v61 = vsub.f32 %v1171_v55, %v1177_v54 }
 0x642   : > { %v1191_v62 = vmul.f32 1.442695, %v1187_v61 }
 0x644   : > { %2701 = vpow2.f32 %v1191_v62 }
 0x64a   : > { %v2702_v63 = vpop.eup %2701 }
 0x64b   : > { %v1199_v57 = vsel %vm901_vm4, %v2702_v63, 0.0 }
 0x64c   : > { %1200 = vadd.xlane.f32.xlu0 %v1199_v57 }
 0x660   : > { %2632 = vrot.lane.b32.xlu0 %v3455_v9, %s2944_s20 }
 0x66b   : > { %v3598_v2 = vpop.f32.mrf.mxu1 }
 0x673   : > { %v3604_v4 = vpop.f32.mrf.mxu1 }
 0x681   : > { %v3600_v14 = vpop.f32.mrf.mxu2 }
 0x689   : > { %v3602_v3 = vpop.f32.mrf.mxu2 }
 0x691   : > { %v1861_v5 = vpop.f32.mrf.mxu2 }
 0x692   : > { %v1898_v6 = vmul.f32 0.35355338, %v1861_v5  ;;  %v1829_v8 = vpop.f32.mrf.mxu1 }
 0x693   : > { %v1897_v43 = vmul.f32 0.35355338, %v1829_v8 }
 0x694   : > { %v1902_v41 = vadd.f32 %v1898_v6, %v3344_v7  ;;  %v2064_v6 = vld [vmem:[#allocation8 + $0x18] sm:$0xff] }
 0x695   : > { %v1906_v42 = vpop.xlane.xlu2 %1905  ;;  %v1901_v11 = vadd.f32 %v1897_v43, %v3339_v0 }
 0x696   : > { %v1916_v12 = vsub.f32 %v1900_v34, %v1906_v42  ;;  %v1910_v9 = vsel %vm901_vm4, %v1902_v41, -inf  ;;  %v1343_v34 = vld [vmem:[#allocation8 + $0x8] sm:$0xff] }
 0x697   : > { %1911 = vmax.xlane.f32.xlu0 %v1910_v9  ;;  %v1907_v13 = vsel %vm901_vm4, %v1901_v11, -inf }
 0x698   : > { %v1920_v15 = vmul.f32 1.442695, %v1916_v12  ;;  %1908 = vmax.xlane.f32.xlu1 %v1907_v13 }
 0x69a   : > { %2703 = vpow2.f32 %v1920_v15 }
 0x69d   : > { %v2628_v17 = vpop.permute.xlu2 %2627 }
 0x69e   : > { %v2629_v16 = vunpack.i.l.bf16 %v2628_v17  ;;  %v2630_v19 = vunpack.i.h.bf16 %v2628_v17 }
 0x6a0   : > { %v3610_v18 = vpop.eup %2703  ;;  %1244 = vmatpush.msrb.mxu0 %v2629_v16 }
 0x6a1   : > { %v1928_v7 = vsel %vm901_vm4, %v3610_v18, 0.0 }
 0x6a2   : > { %1929 = vadd.xlane.f32.xlu1 %v1928_v7  ;;  %1245 = vmatpush.msrb.mxu0 %v2630_v19  ;;  %v2654_v7 = vld [vmem:[%s3776_s22] ss:$0 sm:$0xff] }
 0x6a4   : > { %1371 = vmatpush.msra.mxu0 %v1343_v34 }
 0x6aa   : > { %v1915_v0 = vpop.xlane.xlu1 %1914 }
 0x6ab   : > { %v1919_v20 = vsub.f32 %v1903_v52, %v1915_v0  ;;  %2642 = vrot.lane.b32.xlu0 %v3467_v10, %s2944_s20 }
 0x6ad   : > { %v1926_v21 = vmul.f32 1.442695, %v1919_v20 }
 0x6af   : > { %2705 = vpow2.f32 %v1926_v21 }
 0x6b5   : > { %v3616_v24 = vpop.eup %2705 }
 0x6b6   : > { %v1937_v35 = vsel %vm901_vm4, %v3616_v24, 0.0 }
 0x6b7   : > { %1938 = vadd.xlane.f32.xlu2 %v1937_v35 }
 0x6bf   : > { %v1201_v55 = vpop.xlane.xlu0 %1200 }
 0x6c0   : > { %2707 = vrcp.f32 %v1201_v55 }
 0x6c6   : > { %v2708_v25 = vpop.eup %2707 }
 0x6c7   : > { %v1215_v56 = vmul.f32 %v2708_v25, %v2702_v63 }
 0x6c9   : > { %2447 = vmatmul.msk.f32.vlgmr.msrb.gmra.mxu0 %vm901_vm4, %v1215_v56 }
 0x6ca   : > { %1750 = vmatpush.msrb.mxu0 %v1722_v48  ;;  %v2734_v48 = vld [vmem:[%s3153_s9 + $0x18] sm:$0xff] }
 0x6d2   : > { %v2633_v26 = vpop.permute.xlu0 %2632 }
 0x6d3   : > { %v2634_v58 = vunpack.i.l.bf16 %v2633_v26  ;;  %v2635_v27 = vunpack.i.h.bf16 %v2633_v26 }
 0x6d5   : > { %2029 = vmatpush.msrb.mxu3 %v2634_v58 }
 0x6d7   : > { %2030 = vmatpush.msrb.mxu3 %v2635_v27 }
 0x6d9   : > { %2507 = vmatpush.msra.mxu3 %v2064_v6 }
 0x70a   : > { %v1912_v10 = vpop.xlane.xlu0 %1911 }
 0x70b   : > { %v1918_v32 = vsub.f32 %v1902_v41, %v1912_v10  ;;  %v1909_v59 = vpop.xlane.xlu1 %1908 }
 0x70c   : > { %v1917_v60 = vsub.f32 %v1901_v11, %v1909_v59  ;;  %v2732_v59 = vld [vmem:[%s3153_s9] sm:$0xff] }
 0x70d   : > { %v1924_v37 = vmul.f32 1.442695, %v1918_v32 }
 0x70e   : > { %v1922_v39 = vmul.f32 1.442695, %v1917_v60 }
 0x70f   : > { %2709 = vpow2.f32 %v1924_v37 }
 0x710   : > { %2711 = vpow2.f32 %v1922_v39 }
 0x715   : > { %v2710_v40 = vpop.eup %2709 }
 0x716   : > { %v2712_v29 = vpop.eup %2711  ;;  %v1934_v45 = vsel %vm901_vm4, %v2710_v40, 0.0 }
 0x717   : > { %1935 = vadd.xlane.f32.xlu0 %v1934_v45  ;;  %v1931_v22 = vsel %vm901_vm4, %v2712_v29, 0.0 }
 0x718   : > { %1932 = vadd.xlane.f32.xlu1 %v1931_v22 }
 0x71d   : > { %v2643_v46 = vpop.permute.xlu0 %2642 }
 0x71e   : > { %v2644_v30 = vunpack.i.l.bf16 %v2643_v46  ;;  %v2645_v47 = vunpack.i.h.bf16 %v2643_v46 }
 0x720   : > { %2000 = vmatpush.msrb.mxu2 %v2644_v30 }
 0x722   : > { %2001 = vmatpush.msrb.mxu2 %v2645_v47  ;;  %v2733_v47 = vld [vmem:[%s3153_s9 + $0x8] sm:$0xff] }
 0x724   : > { %2092 = vmatpush.msra.mxu2 %v2064_v6 }
 0x72a   : > { %v1939_v53 = vpop.xlane.xlu2 %1938 }
 0x72b   : > { %2647 = vrot.lane.b32.xlu0 %v3396_v1, %s2944_s20  ;;  %v1930_v1 = vpop.xlane.xlu1 %1929 }
 0x731   : > { %2637 = vrot.lane.b32.xlu1 %v3520_v44, %s2944_s20  ;;  %s2869_s20 = sshra.s32 %s2253_s17, 4  ;;  %s2870_s20 = int_to_ptr.hbm [resolvable:$true] %s2869_s20 }
 0x732   : > { %s2871_s25 = scalar_lea.hbm %s2870_s20, 32  ;;  %p2876_p10 = scmp.lt.s32.totalorder %s2870_s20, %s3779_s13 }
 0x733   : > { %p2872_p1 = scmp.ne.s32.totalorder %s2870_s20, %s2871_s25 }
 0x735   : > { %p2873_p4 = pnand %p2872_p1, %p3090_p3 }
 0x737   : > { %p2874_p2 = pneg %p2873_p4 }
 0x746   : > { %v1247_v51 = vpop.f32.mrf.mxu0 }
 0x747   : > { %2451 = vmatmul.msk.f32.vlgmr.msra.gmra.mxu0 %vm764_vm2, %v1247_v51 }
 0x74f   : > { %2452 = vmatmul.msk.f32.gmra.mxu0 %vm764_vm2, %v3567_v28 }
 0x757   : > { %2453 = vmatmul.msk.f32.gmra.mxu0 %vm764_vm2, %v3508_v36 }
 0x75f   : > { %2454 = vmatmul.msk.f32.gmra.mxu0 %vm764_vm2, %v3504_v33 }
 0x767   : > { %2475 = vmatmul.msk.f32.vlgmr.msrb.gmra.mxu0 %vm764_vm2, %v3598_v2 }
 0x76f   : > { %2476 = vmatmul.msk.f32.gmra.mxu0 %vm764_vm2, %v3600_v14 }
 0x777   : > { %2477 = vmatmul.msk.f32.gmra.mxu0 %vm764_vm2, %v3604_v4 }
 0x77f   : > { %2478 = vmatmul.msk.f32.gmra.mxu0 %vm764_vm2, %v3602_v3 }
 0x78a   : > { %v1936_v44 = vpop.xlane.xlu0 %1935 }
 0x78b   : > { %2713 = vrcp.f32 %v1936_v44  ;;  %v1933_v28 = vpop.xlane.xlu1 %1932 }
 0x78c   : > { %2715 = vrcp.f32 %v1933_v28 }
 0x78d   : > { %2717 = vrcp.f32 %v1930_v1  ;;  %v2945_v1 = vmov 32.0  }
 0x78e   : > { %2719 = vrcp.f32 %v1939_v53 }
 0x78f   : > { %2721 = vrcp.f32 %v2945_v1 }
 0x791   : > { %v2714_v36 = vpop.eup %2713 }
 0x792   : > { %v2716_v49 = vpop.eup %2715  ;;  %v1946_v33 = vmul.f32 %v2714_v36, %v2710_v40 }
 0x793   : > { %v1945_v52 = vmul.f32 %v2716_v49, %v2712_v29  ;;  %v2718_v61 = vpop.eup %2717 }
 0x794   : > { %2493 = vmatmul.msk.f32.vlgmr.msrb.gmra.mxu3 %vm901_vm4, %v1946_v33  ;;  %v1944_v2 = vmul.f32 %v2718_v61, %v3610_v18  ;;  %v2720_v4 = vpop.eup %2719 }
 0x795   : > { %2492 = vmatmul.msk.f32.vlgmr.msrb.gmra.mxu2 %vm901_vm4, %v1945_v52  ;;  %v1947_v5 = vmul.f32 %v2720_v4, %v3616_v24  ;;  %v2731_v24 = vld [vmem:[%s3153_s9 + $0x10] sm:$0xff]  ;;  %v2722_v44 = vpop.eup %2721  ;;  %s2875_s9 = scalar_lea.hbm %s3779_s13, 64 }
 0x796   : > { %v2135_v28 = vmul.f32 32.0, %v2722_v44  ;;  %vm2139_vm8 = vweird.f32 %v2722_v44  ;;  %p2877_p11 = scmp.lt.s32.totalorder %s2875_s9, %s2871_s25 }
 0x798   : > { %v2136_v36 = vsub.f32 1.0, %v2135_v28  ;;  %p2878_p9 = por %p2877_p11, %p2876_p10 }
 0x79a   : > { %v2137_v49 = vmul.f32 %v2722_v44, %v2136_v36  ;;  %p2879_p12 = pnand %p2878_p9, %p2874_p2 }
 0x79c   : > { %v2138_v33 = vadd.f32 %v2722_v44, %v2137_v49 }
 0x79d   : > { %v2648_v63 = vpop.permute.xlu0 %2647 }
 0x79e   : > { %v2649_v14 = vunpack.i.l.bf16 %v2648_v63  ;;  %v2650_v3 = vunpack.i.h.bf16 %v2648_v63  ;;  %v2140_v52 = vsel %vm2139_vm8, %v2722_v44, %v2138_v33 }
 0x7a3   : > { %v2638_v54 = vpop.permute.xlu1 %2637 }
 0x7a4   : > { %v2639_v62 = vunpack.i.l.bf16 %v2638_v54  ;;  %v2640_v57 = vunpack.i.h.bf16 %v2638_v54 }
 0x7a6   : > { %1971 = vmatpush.msra.mxu1 %v2639_v62 }
 0x7a8   : > { %1972 = vmatpush.msra.mxu1 %v2640_v57 }
 0x7a9   : > { %2491 = vmatmul.msk.f32.vlgmr.msra.gmra.mxu1 %vm901_vm4, %v1944_v2 }
 0x7aa   : > { %2058 = vmatpush.msrb.mxu1 %v2649_v14 }
 0x7ac   : > { %2059 = vmatpush.msrb.mxu1 %v2650_v3 }
 0x7b1   : > { %2494 = vmatmul.msk.f32.vlgmr.msrb.gmra.mxu1 %vm901_vm4, %v1947_v5 }
 0x7c4   : > { %v1373_v11 = vpop.f32.mrf.mxu0 }
 0x7c5   : > { %v1415_v25 = vadd.f32 %v3572_v38, %v1373_v11 }
 0x7cc   : > { %v1376_v12 = vpop.f32.mrf.mxu0 }
 0x7cd   : > { %v1418_v10 = vadd.f32 %v3578_v31, %v1376_v12 }
 0x7d4   : > { %v1379_v9 = vpop.f32.mrf.mxu0 }
 0x7d5   : > { %v1421_v18 = vadd.f32 %v3583_v50, %v1379_v9 }
 0x7dc   : > { %v1382_v13 = vpop.f32.mrf.mxu0 }
 0x7dd   : > { %v1424_v32 = vadd.f32 %v3586_v23, %v1382_v13 }
 0x7e4   : > { %v1752_v15 = vpop.f32.mrf.mxu0 }
 0x7e5   : > { %v1764_v56 = vadd.f32 %v1752_v15, %v1415_v25 }
 0x7ec   : > { %v1755_v17 = vpop.f32.mrf.mxu0 }
 0x7ed   : > { %v1765_v37 = vadd.f32 %v1755_v17, %v1418_v10 }
 0x7f4   : > { %v1758_v16 = vpop.f32.mrf.mxu0 }
 0x7f5   : > { %v1766_v19 = vadd.f32 %v1758_v16, %v1421_v18 }
 0x7fc   : > { %v1761_v27 = vpop.f32.mrf.mxu0 }
 0x7fd   : > { %v1767_v39 = vadd.f32 %v1761_v27, %v1424_v32 }
 0x817   : > { %v2032_v8 = vpop.f32.mrf.mxu3 }
 0x818   : > { %2497 = vmatmul.msk.f32.vlgmr.msra.gmra.mxu3 %vm764_vm2, %v2032_v8  ;;  %v2003_v41 = vpop.f32.mrf.mxu2 }
 0x826   : > { %v1974_v43 = vpop.f32.mrf.mxu1 }
 0x827   : > { %2495 = vmatmul.msk.f32.vlgmr.msra.gmra.mxu2 %vm764_vm2, %v1974_v43 }
 0x82e   : > { %v2061_v42 = vpop.f32.mrf.mxu1 }
 0x82f   : > { %2496 = vmatmul.msk.f32.gmra.mxu2 %vm764_vm2, %v2003_v41  ;;  %2498 = vmatmul.msk.f32.gmra.mxu3 %vm764_vm2, %v2061_v42 }
 0x89b   : > { %v2100_v0 = vpop.f32.mrf.mxu3 }
 0x89c   : > { %v2108_v20 = vadd.f32 %v2100_v0, %v1766_v19 }
 0x89e   : > { %v2116_v21 = vadd.f32 %v2654_v7, %v2108_v20 }
 0x8a0   : > { %v2120_v35 = vadd.f32 %v2731_v24, %v2116_v21 }
 0x8a2   : > { %v2128_v55 = vsel %vm583_vm0, %v2120_v35, 0.0 }
 0x8a3   : > { %2129 = vadd.xlane.f32.xlu2 %v2128_v55 }
 0x8aa   : > { %v2094_v26 = vpop.f32.mrf.mxu2 }
 0x8ab   : > { %v2106_v58 = vadd.f32 %v2094_v26, %v1764_v56 }
 0x8ad   : > { %v2114_v50 = vadd.f32 %v2654_v7, %v2106_v58 }
 0x8af   : > { %v2118_v60 = vadd.f32 %v2732_v59, %v2114_v50 }
 0x8b1   : > { %v2122_v40 = vsel %vm583_vm0, %v2118_v60, 0.0 }
 0x8b2   : > { %v2103_v29 = vpop.f32.mrf.mxu3  ;;  %2123 = vadd.xlane.f32.xlu1 %v2122_v40  ;;  %v2097_v38 = vpop.f32.mrf.mxu2 }
 0x8b3   : > { %v2109_v45 = vadd.f32 %v2103_v29, %v1767_v39  ;;  %v2107_v22 = vadd.f32 %v2097_v38, %v1765_v37  ;;  %v2655_v37 = vld [vmem:[%s3777_s12] ss:$0 sm:$0xff] }
 0x8b5   : > { %v2117_v46 = vadd.f32 %v2654_v7, %v2109_v45  ;;  %v2115_v30 = vadd.f32 %v2654_v7, %v2107_v22  ;;  %v2656_v45 = vld [vmem:[%s3778_s3] ss:$0 sm:$0xff] }
 0x8b7   : > { %v2119_v34 = vadd.f32 %v2733_v47, %v2115_v30  ;;  %v2121_v31 = vadd.f32 %v2734_v48, %v2117_v46 }
 0x8b9   : > { %v2125_v51 = vsel %vm583_vm0, %v2119_v34, 0.0  ;;  %v2131_v23 = vsel %vm583_vm0, %v2121_v31, 0.0 }
 0x8ba   : > { %2126 = vadd.xlane.f32.xlu0 %v2125_v51  ;;  %2132 = vadd.xlane.f32.xlu2 %v2131_v23 }
 0x916   : > { %v2130_v53 = vpop.xlane.xlu2 %2129 }
 0x917   : > { %v2143_v62 = vmul.f32 %v2140_v52, %v2130_v53 }
 0x919   : > { %v3667_v2 = vsub.f32 %v2120_v35, %v2143_v62 }
 0x91b   : > { %v2151_v41 = vmul.f32 %v3667_v2, %v3667_v2 }
 0x91d   : > { %v2159_v9 = vsel %vm583_vm0, %v2151_v41, 0.0 }
 0x925   : > { %v2124_v54 = vpop.xlane.xlu1 %2123 }
 0x926   : > { %v2141_v61 = vmul.f32 %v2140_v52, %v2124_v54 }
 0x928   : > { %v2145_v63 = vsub.f32 %v2118_v60, %v2141_v61 }
 0x92a   : > { %v2149_v57 = vmul.f32 %v2145_v63, %v2145_v63 }
 0x92c   : > { %v2153_v14 = vsel %vm583_vm0, %v2149_v57, 0.0 }
 0x92d   : > { %v2127_v3 = vpop.xlane.xlu0 %2126  ;;  %2154 = vadd.xlane.f32.xlu2 %v2153_v14  ;;  %v2133_v4 = vpop.xlane.xlu2 %2132 }
 0x92e   : > { %v2142_v5 = vmul.f32 %v2140_v52, %v2127_v3  ;;  %v2144_v6 = vmul.f32 %v2140_v52, %v2133_v4 }
 0x930   : > { %v3670_v8 = vsub.f32 %v2119_v34, %v2142_v5  ;;  %v3672_v43 = vsub.f32 %v2121_v31, %v2144_v6 }
 0x932   : > { %v2150_v42 = vmul.f32 %v3670_v8, %v3670_v8  ;;  %v2152_v11 = vmul.f32 %v3672_v43, %v3672_v43 }
 0x934   : > { %v2156_v12 = vsel %vm583_vm0, %v2150_v42, 0.0  ;;  %v2162_v13 = vsel %vm583_vm0, %v2152_v11, 0.0 }
 0x935   : > { %2157 = vadd.xlane.f32.xlu1 %v2156_v12  ;;  %2160 = vadd.xlane.f32.xlu2 %v2159_v9 }
 0x936   : > { %2163 = vadd.xlane.f32.xlu0 %v2162_v13 }
 0x9a0   : > { %v2155_v15 = vpop.xlane.xlu2 %2154 }
 0x9a1   : > { %v2165_v17 = vmul.f32 %v2155_v15, %v2140_v52 }
 0x9a3   : > { %v2169_v16 = vadd.f32 1e-12, %v2165_v17 }
 0x9a5   : > { %2723 = vrsqrt.f32 %v2169_v16  ;;  %vm2179_vm10 = vweird.f32 %v2169_v16 }
 0x9a8   : > { %v2158_v18 = vpop.xlane.xlu1 %2157  ;;  %v2161_v19 = vpop.xlane.xlu2 %2160 }
 0x9a9   : > { %v2166_v7 = vmul.f32 %v2158_v18, %v2140_v52  ;;  %v2164_v0 = vpop.xlane.xlu0 %2163  ;;  %v2167_v20 = vmul.f32 %v2161_v19, %v2140_v52 }
 0x9aa   : > { %v2168_v21 = vmul.f32 %v2164_v0, %v2140_v52 }
 0x9ab   : > { %v2724_v24 = vpop.eup %2723  ;;  %v2170_v35 = vadd.f32 1e-12, %v2166_v7  ;;  %v2171_v55 = vadd.f32 1e-12, %v2167_v20 }
 0x9ac   : > { %v2174_v25 = vmul.f32 %v2724_v24, %v2169_v16  ;;  %v2172_v56 = vadd.f32 1e-12, %v2168_v21  ;;  %vm2180_vm9 = vweird.f32 %v2724_v24 }
 0x9ad   : > { %2725 = vrsqrt.f32 %v2170_v35  ;;  %vm2181_vm11 = vmor %vm2179_vm10, %vm2180_vm9  ;;  %vm2189_vm14 = vweird.f32 %v2170_v35  ;;  %vm2199_vm4 = vweird.f32 %v2171_v55 }
 0x9ae   : > { %v2175_v26 = vmul.f32 %v2724_v24, %v2174_v25  ;;  %2727 = vrsqrt.f32 %v2172_v56  ;;  %vm2209_vm2 = vweird.f32 %v2172_v56 }
 0x9af   : > { %2729 = vrsqrt.f32 %v2171_v55 }
 0x9b0   : > { %v2176_v58 = vmul.f32 0.5, %v2175_v26 }
 0x9b2   : > { %v2177_v50 = vsub.f32 1.5, %v2176_v58 }
 0x9b3   : > { %v2726_v27 = vpop.eup %2725 }
 0x9b4   : > { %v2728_v10 = vpop.eup %2727  ;;  %v2178_v32 = vmul.f32 %v2724_v24, %v2177_v50  ;;  %v2184_v59 = vmul.f32 %v2726_v27, %v2170_v35  ;;  %vm2190_vm12 = vweird.f32 %v2726_v27 }
 0x9b5   : > { %v2730_v60 = vpop.eup %2729  ;;  %v2204_v39 = vmul.f32 %v2728_v10, %v2172_v56  ;;  %vm2210_vm13 = vweird.f32 %v2728_v10  ;;  %vm2191_vm1 = vmor %vm2189_vm14, %vm2190_vm12 }
 0x9b6   : > { %v2182_v40 = vsel %vm2181_vm11, %v2724_v24, %v2178_v32  ;;  %v2185_v29 = vmul.f32 %v2726_v27, %v2184_v59  ;;  %v2194_v38 = vmul.f32 %v2730_v60, %v2171_v55  ;;  %vm2200_vm15 = vweird.f32 %v2730_v60  ;;  %vm2211_vm3 = vmor %vm2209_vm2, %vm2210_vm13 }
 0x9b7   : > { %v2213_v22 = vmul.f32 %v2182_v40, %v2145_v63  ;;  %v2205_v46 = vmul.f32 %v2728_v10, %v2204_v39  ;;  %vm2201_vm5 = vmor %vm2199_vm4, %vm2200_vm15 }
 0x9b8   : > { %v2186_v30 = vmul.f32 0.5, %v2185_v29  ;;  %v2195_v47 = vmul.f32 %v2730_v60, %v2194_v38 }
 0x9b9   : > { %v2221_v34 = vmul.f32 %v2655_v37, %v2213_v22  ;;  %v2206_v48 = vmul.f32 0.5, %v2205_v46 }
 0x9ba   : > { %v2187_v31 = vsub.f32 1.5, %v2186_v30  ;;  %v2196_v51 = vmul.f32 0.5, %v2195_v47 }
 0x9bb   : > { %v2229_v23 = vadd.f32 %v2656_v45, %v2221_v34  ;;  %v2207_v1 = vsub.f32 1.5, %v2206_v48 }
 0x9bc   : > { %v2188_v44 = vmul.f32 %v2726_v27, %v2187_v31  ;;  %v2197_v28 = vsub.f32 1.5, %v2196_v51 }
 0x9bd   : > { %2233 = vst.msk [vmem:[%s552_s23] sm:$0xff] %vm583_vm0, %v2229_v23  ;;  %v2208_v36 = vmul.f32 %v2728_v10, %v2207_v1 }
 0x9be   : > { %v2192_v49 = vsel %vm2191_vm1, %v2726_v27, %v2188_v44  ;;  %v2198_v33 = vmul.f32 %v2730_v60, %v2197_v28 }
 0x9bf   : > { %v2214_v52 = vmul.f32 %v2192_v49, %v3670_v8  ;;  %v2212_v53 = vsel %vm2211_vm3, %v2728_v10, %v2208_v36 }
 0x9c0   : > { %v2216_v54 = vmul.f32 %v2212_v53, %v3672_v43  ;;  %v2202_v61 = vsel %vm2201_vm5, %v2730_v60, %v2198_v33 }
 0x9c1   : > { %v2222_v62 = vmul.f32 %v2655_v37, %v2214_v52  ;;  %v2215_v63 = vmul.f32 %v2202_v61, %v3667_v2 }
 0x9c2   : > { %v2224_v57 = vmul.f32 %v2655_v37, %v2216_v54 }
 0x9c3   : > { %v2230_v14 = vadd.f32 %v2656_v45, %v2222_v62  ;;  %v2223_v3 = vmul.f32 %v2655_v37, %v2215_v63 }
 0x9c4   : > { %v2232_v4 = vadd.f32 %v2656_v45, %v2224_v57 }
 0x9c5   : > { %2234 = vst.msk [vmem:[%s552_s23 + $0x8] sm:$0xff] %vm583_vm0, %v2230_v14  ;;  %v2231_v5 = vadd.f32 %v2656_v45, %v2223_v3 }
 0x9c6   : > { %2236 = vst.msk [vmem:[%s552_s23 + $0x18] sm:$0xff] %vm583_vm0, %v2232_v4 }
 0x9c7   : > { %2235 = vst.msk [vmem:[%s552_s23 + $0x10] sm:$0xff] %vm583_vm0, %v2231_v5 }
 0x9c8   : > { %2882 = shalt.err (!%p2879_p12)
}
 0x9c9   : > { %s2946_s21 = smov 128   ;;  %s2947_s10 = smov 8  }
 0x9ca   : > { %2520 = dma.vmem_to_hbm [thread:$0]  (%p3090_p3), %s2251_s29, 512, %s2253_s17, %s2238_s14, %s2946_s21, %s2946_s21, %s2947_s10  }
 0x9cb PF: > { %s3781_s27 = sld [smem:[#allocation16_spill]]  ;;  %p3783_p13 = scmp.ge.s32.totalorder %s2933_s28, 2 }
 0x9cd   : > { %p2537_p0 = pnand %p3783_p13, %p3053_p6 }
 0x9cf   : > { %p2538_p5 = pneg %p2537_p0 }
 0x9d1   : > { %s2267_s19 = sand.u32 1, %s3781_s27  }
 0x9d2   : > { %s2268_s23 = scalar_lea.sflag [#allocation4], %s2267_s19 }
 0x9d3   : > { %2916 = dma.done.wait (%p2538_p5), %s2268_s23, 512  }
 0x9d4   : > { %2918 = vsyncadd (%p2538_p5), %s2268_s23, 4294966784  ;;  %s3784_s28 = sld [smem:[#allocation19_spill]]  ;;  %s3787_s25 = smov %s2925_s26 }
 0x9d5   : > { %s3785_s30 = sld [smem:[#allocation17_spill]] }
 0x9d6   : > { %s3786_s27 = sld [smem:[#allocation21_spill]] }
 0x9da   : > { %p30_p7 = scmp.ge.s32.totalorder %s3784_s28, 4  }
 0x9db   : > { %s3788_s26 = smov %s3785_s30 }
 0x9dc   :  { %32 = sbr.rel (!%p30_p7) target bundleno = 15 (0xf), region = 141 }
 0x9e1   :  { %2274 = vsyncpa [#allocation3], 1 }
 0x9e2   :  { %2276 = vsyncpa [#allocation3 + $0x1], 1 }
 0x9e3   :  { %2277 = vsyncpa [#allocation6], 1 }
 0x9e4   :  { %2279 = vsyncpa [#allocation6 + $0x1], 1 }
 0x9e5   :  { %2280 = vsyncpa [#allocation9], 1 }
 0x9e6   :  { %2281 = vsyncpa [#allocation4], 1 }
 0x9e7   :  { %2283 = vsyncpa [#allocation4 + $0x1], 1 }

</bundles_post_ra>
